<compile_context>
chip_gen: v6e
topology: v6e:2x2x1
jax: 0.10.0
libtpu: 0.0.40
codegen_flags: <defaults>
</compile_context>

<pallas_src>
import functools
import math

import jax
import jax.numpy as jnp
from jax.experimental import pallas as pl
from jax.experimental.pallas import tpu as pltpu

LN_EPS = 1e-12


def _vmem_limit_bytes():
    # ~3/4 of physical VMEM, capped at 64 MiB (safe on every generation:
    # v5e/v6e have 128 MiB, v7x has 64 MiB per TensorCore).
    try:
        cap = pltpu.get_tpu_info().vmem_capacity_bytes
    except Exception:
        cap = 64 * 1024 * 1024
    return int(min(cap * 3 // 4, 64 * 1024 * 1024))


# ---------------------------------------------------------------------------
# Fused kernel: QKV projection + per-head attention + dense + residual + LN.
# One grid step per batch element; weights stay resident in VMEM.
# ---------------------------------------------------------------------------
def _bert_attention_kernel(h_ref, m_ref, wqkv_ref, bqkv_ref, wo_ref, bo_ref,
                           gamma_ref, beta_ref, o_ref, *, num_heads, head_dim):
    h = h_ref[0]                                   # (S, H), native dtype
    S, H = h.shape
    dt = h.dtype

    # ---- fused Q|K|V projection: one wide (S,H) @ (H,3H) MXU matmul -------
    qkv = jnp.dot(h, wqkv_ref[...], preferred_element_type=jnp.float32)
    qkv = (qkv + bqkv_ref[...].astype(jnp.float32)).astype(dt)     # (S, 3H)
    q = qkv[:, :H]                  # softmax scale pre-folded into Wq / bq
    k = qkv[:, H:2 * H]
    v = qkv[:, 2 * H:]

    mask = m_ref[0].astype(jnp.float32)            # (1, S) additive key mask

    # ---- per-head scaled dot-product attention (heads unrolled, in VMEM) --
    ctx_heads = []
    for i in range(num_heads):
        lo = i * head_dim
        hi = lo + head_dim
        qi, ki, vi = q[:, lo:hi], k[:, lo:hi], v[:, lo:hi]          # (S, d)
        s = jax.lax.dot_general(qi, ki, (((1,), (1,)), ((), ())),
                                preferred_element_type=jnp.float32)  # (S, S)
        s = s + mask
        m = jnp.max(s, axis=-1, keepdims=True)
        e = jnp.exp(s - m)                          # unnormalized probs, f32
        l = jnp.sum(e, axis=-1, keepdims=True)      # (S, 1)
        # TODO(synk): attention-probs dropout is identity in eval mode.
        ci = jnp.dot(e.astype(dt), vi, preferred_element_type=jnp.float32)
        # Normalize after probs@V: (S,d) muls instead of (S,S); EUP reciprocal.
        ctx_heads.append(ci * pl.reciprocal(l, approx=True))
    ctx = jnp.concatenate(ctx_heads, axis=-1)       # (S, H) f32, lane-dense

    # ---- BertSelfOutput: dense + residual + LayerNorm(eps=1e-12) ----------
    y = jnp.dot(ctx.astype(dt), wo_ref[...], preferred_element_type=jnp.float32)
    y = y + bo_ref[...].astype(jnp.float32) + h.astype(jnp.float32)
    # TODO(synk): hidden-state dropout is identity in eval mode.
    mean = jnp.mean(y, axis=-1, keepdims=True)
    yc = y - mean                                   # two-pass LN: no cancellation
    var = jnp.mean(yc * yc, axis=-1, keepdims=True)
    out = yc * jax.lax.rsqrt(var + LN_EPS)
    out = out * gamma_ref[...].astype(jnp.float32) + beta_ref[...].astype(jnp.float32)
    o_ref[0] = out.astype(o_ref.dtype)


# ---------------------------------------------------------------------------
# Full BertAttention forward (eval mode).
# ---------------------------------------------------------------------------
def bert_attention(hidden_states, attention_mask, params, num_heads):
    """hidden_states: [B,S,H]; attention_mask: additive key mask [B,S] or None.

    params holds PyTorch-layout Linear weights ([out_features, in_features]):
      wq, wk, wv, wo : [H, H];  bq, bk, bv, bo : [H];  ln_gamma, ln_beta : [H].
    Runs in hidden_states.dtype (pass bf16 for the fast MXU path on v6e/v7x);
    matmuls accumulate in f32, softmax/LayerNorm math is f32.
    """
    B, S, H = hidden_states.shape
    assert H % num_heads == 0, "hidden size must be divisible by num_heads"
    head_dim = H // num_heads
    dt = hidden_states.dtype
    scale = 1.0 / math.sqrt(head_dim)

    # PyTorch nn.Linear weight is [out, in]; transpose once so y = x @ W.
    # Fold the softmax scale into Wq/bq (free) and fuse Q|K|V into one weight.
    wq_t = params["wq"].T.astype(jnp.float32) * scale
    wk_t = params["wk"].T.astype(jnp.float32)
    wv_t = params["wv"].T.astype(jnp.float32)
    wqkv = jnp.concatenate([wq_t, wk_t, wv_t], axis=1).astype(dt)   # (H, 3H)
    bqkv = jnp.concatenate([params["bq"].astype(jnp.float32) * scale,
                            params["bk"].astype(jnp.float32),
                            params["bv"].astype(jnp.float32)]).reshape(1, 3 * H)
    wo = params["wo"].T.astype(dt)                                  # (H, H)
    bo = params["bo"].astype(jnp.float32).reshape(1, H)
    gamma = params["ln_gamma"].astype(jnp.float32).reshape(1, H)
    beta = params["ln_beta"].astype(jnp.float32).reshape(1, H)

    if attention_mask is None:
        attention_mask = jnp.zeros((B, S), dtype=jnp.float32)
    mask3 = attention_mask.astype(jnp.float32).reshape(B, 1, S)     # keep f32

    kernel = functools.partial(_bert_attention_kernel,
                               num_heads=num_heads, head_dim=head_dim)

    def build(single_buffer_weights):
        def resident(shape):
            kwargs = {}
            if single_buffer_weights:
                # Constant index_map -> never re-DMA'd; a single buffer saves
                # VMEM (matters most on v7x's 64 MiB).
                kwargs["pipeline_mode"] = pl.Buffered(1)
            return pl.BlockSpec(shape, lambda b: (0,) * len(shape), **kwargs)

        act = pl.BlockSpec((1, S, H), lambda b: (b, 0, 0))
        return pl.pallas_call(
            kernel,
            out_shape=jax.ShapeDtypeStruct((B, S, H), dt),
            grid_spec=pl.GridSpec(
                grid=(B,),                  # one step per batch element
                in_specs=[act,
                          pl.BlockSpec((1, 1, S), lambda b: (b, 0, 0)),
                          resident((H, 3 * H)),
                          resident((1, 3 * H)),
                          resident((H, H)),
                          resident((1, H)),
                          resident((1, H)),
                          resident((1, H))],
                out_specs=act,
            ),
            compiler_params=pltpu.CompilerParams(
                dimension_semantics=("parallel",),     # megacore sharding
                vmem_limit_bytes=_vmem_limit_bytes(),
            ),
        )

    args = (hidden_states, mask3, wqkv, bqkv, wo, bo, gamma, beta)
    try:
        return build(True)(*args)
    except Exception:
        # Fallback if this jax build rejects pipeline_mode=pl.Buffered(1).
        return build(False)(*args)


# ---------------------------------------------------------------------------
# Pure-JAX reference (mirrors the PyTorch module).
# ---------------------------------------------------------------------------
def reference(hidden_states, attention_mask, params, num_heads):
    B, S, H = hidden_states.shape
    d = H // num_heads

    def linear(x, w, b):                       # w in PyTorch [out, in] layout
        return jnp.einsum("bsh,oh->bso", x, w) + b

    q = linear(hidden_states, params["wq"], params["bq"])
    k = linear(hidden_states, params["wk"], params["bk"])
    v = linear(hidden_states, params["wv"], params["bv"])

    def split(x):
        return x.reshape(B, S, num_heads, d).transpose(0, 2, 1, 3)

    q, k, v = split(q), split(k), split(v)
    scores = jnp.einsum("bhqd,bhkd->bhqk", q, k) / math.sqrt(d)
    if attention_mask is not None:
        scores = scores + attention_mask[:, None, None, :]
    probs = jax.nn.softmax(scores, axis=-1)
    ctx = jnp.einsum("bhqk,bhkd->bhqd", probs, v)
    ctx = ctx.transpose(0, 2, 1, 3).reshape(B, S, H)

    y = linear(ctx, params["wo"], params["bo"]) + hidden_states
    mean = jnp.mean(y, axis=-1, keepdims=True)
    var = jnp.mean((y - mean) ** 2, axis=-1, keepdims=True)
    return ((y - mean) * jax.lax.rsqrt(var + LN_EPS)
            * params["ln_gamma"] + params["ln_beta"])


if __name__ == "__main__":
    # Small demo config: batch=2, seq=8, hidden=32, heads=4 (head_dim=8).
    # Production BERT shapes (H=768/1024, head_dim=64) are lane-dense
    # multiples of 64/128 and benefit more from the fused layout.
    B, S, H, NUM_HEADS = 2, 8, 32, 4
    key = jax.random.PRNGKey(0)
    keys = jax.random.split(key, 9)

    hidden_states = jax.random.normal(keys[0], (B, S, H), dtype=jnp.float32)

    bound = 1.0 / math.sqrt(H)

    def lin_init(kw, kb):
        w = jax.random.uniform(kw, (H, H), minval=-bound, maxval=bound,
                               dtype=jnp.float32)   # PyTorch [out, in] layout
        b = jax.random.uniform(kb, (H,), minval=-bound, maxval=bound,
                               dtype=jnp.float32)
        return w, b

    wq, bq = lin_init(keys[1], keys[2])
    wk, bk = lin_init(keys[3], keys[4])
    wv, bv = lin_init(keys[5], keys[6])
    wo, bo = lin_init(keys[7], keys[8])

    params = dict(wq=wq, bq=bq, wk=wk, bk=bk, wv=wv, bv=bv, wo=wo, bo=bo,
                  ln_gamma=jnp.ones((H,), jnp.float32),
                  ln_beta=jnp.zeros((H,), jnp.float32))

    # Additive key mask: batch 1 masks out its last two key positions.
    attention_mask = jnp.zeros((B, S), dtype=jnp.float32)
    attention_mask = attention_mask.at[1, -2:].set(-1e9)

    # f32 path: tolerance is loose enough for the approx (EUP) reciprocal
    # used in the softmax normalization.
    out = bert_attention(hidden_states, attention_mask, params, NUM_HEADS)
    jax.block_until_ready(out)
    ref = reference(hidden_states, attention_mask, params, NUM_HEADS)
    assert out.shape == (B, S, H)
    err = float(jnp.max(jnp.abs(out - ref)))
    assert err < 2e-3, f"f32 mismatch vs reference: max abs err {err:.3e}"

    # bf16 path (fast MXU on v6e/v7x): weights are cast inside the wrapper,
    # mask / softmax / LayerNorm math stays f32.
    out_bf16 = bert_attention(hidden_states.astype(jnp.bfloat16),
                              attention_mask, params, NUM_HEADS)
    jax.block_until_ready(out_bf16)
    err_bf16 = float(jnp.max(jnp.abs(out_bf16.astype(jnp.float32) - ref)))
    assert err_bf16 < 1e-1, f"bf16 mismatch vs reference: max abs err {err_bf16:.3e}"

    print("KERNEL_OK")
</pallas_src>

<mosaic_0001>
module attributes {stable_mosaic.version = 11 : i64} {
  func.func @_bert_attention_kernel(%arg0: i32, %arg1: memref<1x8x32xf32, #tpu.memory_space<vmem>>, %arg2: memref<1x1x8xf32, #tpu.memory_space<vmem>>, %arg3: memref<32x96xf32, #tpu.memory_space<vmem>>, %arg4: memref<1x96xf32, #tpu.memory_space<vmem>>, %arg5: memref<32x32xf32, #tpu.memory_space<vmem>>, %arg6: memref<1x32xf32, #tpu.memory_space<vmem>>, %arg7: memref<1x32xf32, #tpu.memory_space<vmem>>, %arg8: memref<1x32xf32, #tpu.memory_space<vmem>>, %arg9: memref<1x8x32xf32, #tpu.memory_space<vmem>>) attributes {dimension_semantics = [#tpu.dimension_semantics<parallel>], iteration_bounds = array<i64: 2>, scalar_prefetch = 0 : i64, scratch_operands = 0 : i64, tpu.core_type = #tpu.core_type<tc>, window_params = [{transform_indices = @transform_0, window_bounds = array<i64: 1, 8, 32>}, {transform_indices = @transform_1, window_bounds = array<i64: 1, 1, 8>}, {pipeline_mode = #tpu.pipeline_mode<synchronous>, transform_indices = @transform_2, window_bounds = array<i64: 32, 96>}, {pipeline_mode = #tpu.pipeline_mode<synchronous>, transform_indices = @transform_3, window_bounds = array<i64: 1, 96>}, {pipeline_mode = #tpu.pipeline_mode<synchronous>, transform_indices = @transform_4, window_bounds = array<i64: 32, 32>}, {pipeline_mode = #tpu.pipeline_mode<synchronous>, transform_indices = @transform_5, window_bounds = array<i64: 1, 32>}, {pipeline_mode = #tpu.pipeline_mode<synchronous>, transform_indices = @transform_6, window_bounds = array<i64: 1, 32>}, {pipeline_mode = #tpu.pipeline_mode<synchronous>, transform_indices = @transform_7, window_bounds = array<i64: 1, 32>}, {transform_indices = @transform_8, window_bounds = array<i64: 1, 8, 32>}]} {
    %c0 = arith.constant 0 : index
    %c0_0 = arith.constant 0 : index
    %c0_1 = arith.constant 0 : index
    %0 = vector.load %arg1[%c0, %c0_0, %c0_1] : memref<1x8x32xf32, #tpu.memory_space<vmem>>, vector<1x8x32xf32>
    %1 = vector.shape_cast %0 : vector<1x8x32xf32> to vector<8x32xf32>
    %c0_2 = arith.constant 0 : index
    %c0_3 = arith.constant 0 : index
    %2 = vector.load %arg3[%c0_2, %c0_3] : memref<32x96xf32, #tpu.memory_space<vmem>>, vector<32x96xf32>
    %cst = arith.constant dense<0.000000e+00> : vector<8x96xf32>
    %3 = tpu.matmul %1, %2, %cst {dimension_numbers = #tpu.dot_dimension_numbers<[1], [0], [0], [1], [0, 0, 1, 1], [], []>} : vector<8x32xf32>, vector<32x96xf32>, vector<8x96xf32> -> vector<8x96xf32>
    %c0_4 = arith.constant 0 : index
    %c0_5 = arith.constant 0 : index
    %4 = vector.load %arg4[%c0_4, %c0_5] : memref<1x96xf32, #tpu.memory_space<vmem>>, vector<1x96xf32>
    %5 = vector.broadcast %4 : vector<1x96xf32> to vector<8x96xf32>
    %6 = arith.addf %3, %5 : vector<8x96xf32>
    %7 = vector.extract_strided_slice %6 {offsets = [0, 0], sizes = [8, 32], strides = [1, 1]} : vector<8x96xf32> to vector<8x32xf32>
    %8 = vector.extract_strided_slice %6 {offsets = [0, 32], sizes = [8, 32], strides = [1, 1]} : vector<8x96xf32> to vector<8x32xf32>
    %9 = vector.extract_strided_slice %6 {offsets = [0, 64], sizes = [8, 32], strides = [1, 1]} : vector<8x96xf32> to vector<8x32xf32>
    %c0_6 = arith.constant 0 : index
    %c0_7 = arith.constant 0 : index
    %c0_8 = arith.constant 0 : index
    %10 = vector.load %arg2[%c0_6, %c0_7, %c0_8] : memref<1x1x8xf32, #tpu.memory_space<vmem>>, vector<1x1x8xf32>
    %11 = vector.shape_cast %10 : vector<1x1x8xf32> to vector<1x8xf32>
    %12 = vector.extract_strided_slice %7 {offsets = [0, 0], sizes = [8, 8], strides = [1, 1]} : vector<8x32xf32> to vector<8x8xf32>
    %13 = vector.extract_strided_slice %8 {offsets = [0, 0], sizes = [8, 8], strides = [1, 1]} : vector<8x32xf32> to vector<8x8xf32>
    %14 = vector.extract_strided_slice %9 {offsets = [0, 0], sizes = [8, 8], strides = [1, 1]} : vector<8x32xf32> to vector<8x8xf32>
    %cst_9 = arith.constant dense<0.000000e+00> : vector<8x8xf32>
    %15 = tpu.matmul %12, %13, %cst_9 {dimension_numbers = #tpu.dot_dimension_numbers<[1], [1], [0], [0], [0, 0, 1, 0], [], []>} : vector<8x8xf32>, vector<8x8xf32>, vector<8x8xf32> -> vector<8x8xf32>
    %16 = vector.broadcast %11 : vector<1x8xf32> to vector<8x8xf32>
    %17 = arith.addf %15, %16 : vector<8x8xf32>
    %cst_10 = arith.constant dense<0xFF800000> : vector<8xf32>
    %18 = vector.multi_reduction <maximumf>, %17, %cst_10 [1] : vector<8x8xf32> to vector<8xf32>
    %19 = vector.shape_cast %18 : vector<8xf32> to vector<8x1xf32>
    %20 = vector.broadcast %19 : vector<8x1xf32> to vector<8x8xf32>
    %21 = arith.subf %17, %20 : vector<8x8xf32>
    %22 = math.exp %21 : vector<8x8xf32>
    %cst_11 = arith.constant dense<0.000000e+00> : vector<8xf32>
    %23 = vector.multi_reduction <add>, %22, %cst_11 [1] : vector<8x8xf32> to vector<8xf32>
    %24 = vector.shape_cast %23 : vector<8xf32> to vector<8x1xf32>
    %cst_12 = arith.constant dense<0.000000e+00> : vector<8x8xf32>
    %25 = tpu.matmul %22, %14, %cst_12 {dimension_numbers = #tpu.dot_dimension_numbers<[1], [0], [0], [1], [0, 0, 1, 1], [], []>} : vector<8x8xf32>, vector<8x8xf32>, vector<8x8xf32> -> vector<8x8xf32>
    %26 = tpu.reciprocal %24 {approx = true} : vector<8x1xf32> -> vector<8x1xf32>
    %27 = vector.broadcast %26 : vector<8x1xf32> to vector<8x8xf32>
    %28 = arith.mulf %25, %27 : vector<8x8xf32>
    %29 = vector.extract_strided_slice %7 {offsets = [0, 8], sizes = [8, 8], strides = [1, 1]} : vector<8x32xf32> to vector<8x8xf32>
    %30 = vector.extract_strided_slice %8 {offsets = [0, 8], sizes = [8, 8], strides = [1, 1]} : vector<8x32xf32> to vector<8x8xf32>
    %31 = vector.extract_strided_slice %9 {offsets = [0, 8], sizes = [8, 8], strides = [1, 1]} : vector<8x32xf32> to vector<8x8xf32>
    %cst_13 = arith.constant dense<0.000000e+00> : vector<8x8xf32>
    %32 = tpu.matmul %29, %30, %cst_13 {dimension_numbers = #tpu.dot_dimension_numbers<[1], [1], [0], [0], [0, 0, 1, 0], [], []>} : vector<8x8xf32>, vector<8x8xf32>, vector<8x8xf32> -> vector<8x8xf32>
    %33 = vector.broadcast %11 : vector<1x8xf32> to vector<8x8xf32>
    %34 = arith.addf %32, %33 : vector<8x8xf32>
    %cst_14 = arith.constant dense<0xFF800000> : vector<8xf32>
    %35 = vector.multi_reduction <maximumf>, %34, %cst_14 [1] : vector<8x8xf32> to vector<8xf32>
    %36 = vector.shape_cast %35 : vector<8xf32> to vector<8x1xf32>
    %37 = vector.broadcast %36 : vector<8x1xf32> to vector<8x8xf32>
    %38 = arith.subf %34, %37 : vector<8x8xf32>
    %39 = math.exp %38 : vector<8x8xf32>
    %cst_15 = arith.constant dense<0.000000e+00> : vector<8xf32>
    %40 = vector.multi_reduction <add>, %39, %cst_15 [1] : vector<8x8xf32> to vector<8xf32>
    %41 = vector.shape_cast %40 : vector<8xf32> to vector<8x1xf32>
    %cst_16 = arith.constant dense<0.000000e+00> : vector<8x8xf32>
    %42 = tpu.matmul %39, %31, %cst_16 {dimension_numbers = #tpu.dot_dimension_numbers<[1], [0], [0], [1], [0, 0, 1, 1], [], []>} : vector<8x8xf32>, vector<8x8xf32>, vector<8x8xf32> -> vector<8x8xf32>
    %43 = tpu.reciprocal %41 {approx = true} : vector<8x1xf32> -> vector<8x1xf32>
    %44 = vector.broadcast %43 : vector<8x1xf32> to vector<8x8xf32>
    %45 = arith.mulf %42, %44 : vector<8x8xf32>
    %46 = vector.extract_strided_slice %7 {offsets = [0, 16], sizes = [8, 8], strides = [1, 1]} : vector<8x32xf32> to vector<8x8xf32>
    %47 = vector.extract_strided_slice %8 {offsets = [0, 16], sizes = [8, 8], strides = [1, 1]} : vector<8x32xf32> to vector<8x8xf32>
    %48 = vector.extract_strided_slice %9 {offsets = [0, 16], sizes = [8, 8], strides = [1, 1]} : vector<8x32xf32> to vector<8x8xf32>
    %cst_17 = arith.constant dense<0.000000e+00> : vector<8x8xf32>
    %49 = tpu.matmul %46, %47, %cst_17 {dimension_numbers = #tpu.dot_dimension_numbers<[1], [1], [0], [0], [0, 0, 1, 0], [], []>} : vector<8x8xf32>, vector<8x8xf32>, vector<8x8xf32> -> vector<8x8xf32>
    %50 = vector.broadcast %11 : vector<1x8xf32> to vector<8x8xf32>
    %51 = arith.addf %49, %50 : vector<8x8xf32>
    %cst_18 = arith.constant dense<0xFF800000> : vector<8xf32>
    %52 = vector.multi_reduction <maximumf>, %51, %cst_18 [1] : vector<8x8xf32> to vector<8xf32>
    %53 = vector.shape_cast %52 : vector<8xf32> to vector<8x1xf32>
    %54 = vector.broadcast %53 : vector<8x1xf32> to vector<8x8xf32>
    %55 = arith.subf %51, %54 : vector<8x8xf32>
    %56 = math.exp %55 : vector<8x8xf32>
    %cst_19 = arith.constant dense<0.000000e+00> : vector<8xf32>
    %57 = vector.multi_reduction <add>, %56, %cst_19 [1] : vector<8x8xf32> to vector<8xf32>
    %58 = vector.shape_cast %57 : vector<8xf32> to vector<8x1xf32>
    %cst_20 = arith.constant dense<0.000000e+00> : vector<8x8xf32>
    %59 = tpu.matmul %56, %48, %cst_20 {dimension_numbers = #tpu.dot_dimension_numbers<[1], [0], [0], [1], [0, 0, 1, 1], [], []>} : vector<8x8xf32>, vector<8x8xf32>, vector<8x8xf32> -> vector<8x8xf32>
    %60 = tpu.reciprocal %58 {approx = true} : vector<8x1xf32> -> vector<8x1xf32>
    %61 = vector.broadcast %60 : vector<8x1xf32> to vector<8x8xf32>
    %62 = arith.mulf %59, %61 : vector<8x8xf32>
    %63 = vector.extract_strided_slice %7 {offsets = [0, 24], sizes = [8, 8], strides = [1, 1]} : vector<8x32xf32> to vector<8x8xf32>
    %64 = vector.extract_strided_slice %8 {offsets = [0, 24], sizes = [8, 8], strides = [1, 1]} : vector<8x32xf32> to vector<8x8xf32>
    %65 = vector.extract_strided_slice %9 {offsets = [0, 24], sizes = [8, 8], strides = [1, 1]} : vector<8x32xf32> to vector<8x8xf32>
    %cst_21 = arith.constant dense<0.000000e+00> : vector<8x8xf32>
    %66 = tpu.matmul %63, %64, %cst_21 {dimension_numbers = #tpu.dot_dimension_numbers<[1], [1], [0], [0], [0, 0, 1, 0], [], []>} : vector<8x8xf32>, vector<8x8xf32>, vector<8x8xf32> -> vector<8x8xf32>
    %67 = vector.broadcast %11 : vector<1x8xf32> to vector<8x8xf32>
    %68 = arith.addf %66, %67 : vector<8x8xf32>
    %cst_22 = arith.constant dense<0xFF800000> : vector<8xf32>
    %69 = vector.multi_reduction <maximumf>, %68, %cst_22 [1] : vector<8x8xf32> to vector<8xf32>
    %70 = vector.shape_cast %69 : vector<8xf32> to vector<8x1xf32>
    %71 = vector.broadcast %70 : vector<8x1xf32> to vector<8x8xf32>
    %72 = arith.subf %68, %71 : vector<8x8xf32>
    %73 = math.exp %72 : vector<8x8xf32>
    %cst_23 = arith.constant dense<0.000000e+00> : vector<8xf32>
    %74 = vector.multi_reduction <add>, %73, %cst_23 [1] : vector<8x8xf32> to vector<8xf32>
    %75 = vector.shape_cast %74 : vector<8xf32> to vector<8x1xf32>
    %cst_24 = arith.constant dense<0.000000e+00> : vector<8x8xf32>
    %76 = tpu.matmul %73, %65, %cst_24 {dimension_numbers = #tpu.dot_dimension_numbers<[1], [0], [0], [1], [0, 0, 1, 1], [], []>} : vector<8x8xf32>, vector<8x8xf32>, vector<8x8xf32> -> vector<8x8xf32>
    %77 = tpu.reciprocal %75 {approx = true} : vector<8x1xf32> -> vector<8x1xf32>
    %78 = vector.broadcast %77 : vector<8x1xf32> to vector<8x8xf32>
    %79 = arith.mulf %76, %78 : vector<8x8xf32>
    %80 = tpu.concatenate %28, %45, %62, %79 in 1 : vector<8x8xf32>, vector<8x8xf32>, vector<8x8xf32>, vector<8x8xf32> -> vector<8x32xf32>
    %c0_25 = arith.constant 0 : index
    %c0_26 = arith.constant 0 : index
    %81 = vector.load %arg5[%c0_25, %c0_26] : memref<32x32xf32, #tpu.memory_space<vmem>>, vector<32x32xf32>
    %cst_27 = arith.constant dense<0.000000e+00> : vector<8x32xf32>
    %82 = tpu.matmul %80, %81, %cst_27 {dimension_numbers = #tpu.dot_dimension_numbers<[1], [0], [0], [1], [0, 0, 1, 1], [], []>} : vector<8x32xf32>, vector<32x32xf32>, vector<8x32xf32> -> vector<8x32xf32>
    %c0_28 = arith.constant 0 : index
    %c0_29 = arith.constant 0 : index
    %83 = vector.load %arg6[%c0_28, %c0_29] : memref<1x32xf32, #tpu.memory_space<vmem>>, vector<1x32xf32>
    %84 = vector.broadcast %83 : vector<1x32xf32> to vector<8x32xf32>
    %85 = arith.addf %82, %84 : vector<8x32xf32>
    %86 = arith.addf %85, %1 : vector<8x32xf32>
    %cst_30 = arith.constant dense<0.000000e+00> : vector<8xf32>
    %87 = vector.multi_reduction <add>, %86, %cst_30 [1] : vector<8x32xf32> to vector<8xf32>
    %88 = vector.shape_cast %87 : vector<8xf32> to vector<8x1xf32>
    %cst_31 = arith.constant 3.200000e+01 : f32
    %89 = vector.broadcast %cst_31 : f32 to vector<8x1xf32>
    %90 = arith.divf %88, %89 : vector<8x1xf32>
    %91 = vector.broadcast %90 : vector<8x1xf32> to vector<8x32xf32>
    %92 = arith.subf %86, %91 : vector<8x32xf32>
    %93 = arith.mulf %92, %92 : vector<8x32xf32>
    %cst_32 = arith.constant dense<0.000000e+00> : vector<8xf32>
    %94 = vector.multi_reduction <add>, %93, %cst_32 [1] : vector<8x32xf32> to vector<8xf32>
    %95 = vector.shape_cast %94 : vector<8xf32> to vector<8x1xf32>
    %cst_33 = arith.constant 3.200000e+01 : f32
    %96 = vector.broadcast %cst_33 : f32 to vector<8x1xf32>
    %97 = arith.divf %95, %96 : vector<8x1xf32>
    %cst_34 = arith.constant 9.99999996E-13 : f32
    %98 = vector.broadcast %cst_34 : f32 to vector<8x1xf32>
    %99 = arith.addf %97, %98 : vector<8x1xf32>
    %100 = math.rsqrt %99 : vector<8x1xf32>
    %101 = vector.broadcast %100 : vector<8x1xf32> to vector<8x32xf32>
    %102 = arith.mulf %92, %101 : vector<8x32xf32>
    %c0_35 = arith.constant 0 : index
    %c0_36 = arith.constant 0 : index
    %103 = vector.load %arg7[%c0_35, %c0_36] : memref<1x32xf32, #tpu.memory_space<vmem>>, vector<1x32xf32>
    %104 = vector.broadcast %103 : vector<1x32xf32> to vector<8x32xf32>
    %105 = arith.mulf %102, %104 : vector<8x32xf32>
    %c0_37 = arith.constant 0 : index
    %c0_38 = arith.constant 0 : index
    %106 = vector.load %arg8[%c0_37, %c0_38] : memref<1x32xf32, #tpu.memory_space<vmem>>, vector<1x32xf32>
    %107 = vector.broadcast %106 : vector<1x32xf32> to vector<8x32xf32>
    %108 = arith.addf %105, %107 : vector<8x32xf32>
    %c0_39 = arith.constant 0 : index
    %c0_40 = arith.constant 0 : index
    %c0_41 = arith.constant 0 : index
    %109 = vector.load %arg9[%c0_39, %c0_40, %c0_41] : memref<1x8x32xf32, #tpu.memory_space<vmem>>, vector<1x8x32xf32>
    %110 = vector.shape_cast %109 : vector<1x8x32xf32> to vector<8x32xf32>
    %111 = vector.shape_cast %108 : vector<8x32xf32> to vector<1x8x32xf32>
    tpu.vector_store %arg9[%c0_39, %c0_40, %c0_41], %111 {strides = array<i32>} : memref<1x8x32xf32, #tpu.memory_space<vmem>>, vector<1x8x32xf32>,
    return
  }
  func.func @transform_0(%arg0: i32) -> (i32, i32, i32) {
    %c0_i32 = arith.constant 0 : i32
    %c0_i32_0 = arith.constant 0 : i32
    %c0_i32_1 = arith.constant 0 : i32
    return %arg0, %c0_i32, %c0_i32_0 : i32, i32, i32
  }
  func.func @transform_1(%arg0: i32) -> (i32, i32, i32) {
    %c0_i32 = arith.constant 0 : i32
    %c0_i32_0 = arith.constant 0 : i32
    %c0_i32_1 = arith.constant 0 : i32
    return %arg0, %c0_i32, %c0_i32_0 : i32, i32, i32
  }
  func.func @transform_2(%arg0: i32) -> (i32, i32) {
    %c0_i32 = arith.constant 0 : i32
    %c0_i32_0 = arith.constant 0 : i32
    %c0_i32_1 = arith.constant 0 : i32
    return %c0_i32, %c0_i32_0 : i32, i32
  }
  func.func @transform_3(%arg0: i32) -> (i32, i32) {
    %c0_i32 = arith.constant 0 : i32
    %c0_i32_0 = arith.constant 0 : i32
    %c0_i32_1 = arith.constant 0 : i32
    return %c0_i32, %c0_i32_0 : i32, i32
  }
  func.func @transform_4(%arg0: i32) -> (i32, i32) {
    %c0_i32 = arith.constant 0 : i32
    %c0_i32_0 = arith.constant 0 : i32
    %c0_i32_1 = arith.constant 0 : i32
    return %c0_i32, %c0_i32_0 : i32, i32
  }
  func.func @transform_5(%arg0: i32) -> (i32, i32) {
    %c0_i32 = arith.constant 0 : i32
    %c0_i32_0 = arith.constant 0 : i32
    %c0_i32_1 = arith.constant 0 : i32
    return %c0_i32, %c0_i32_0 : i32, i32
  }
  func.func @transform_6(%arg0: i32) -> (i32, i32) {
    %c0_i32 = arith.constant 0 : i32
    %c0_i32_0 = arith.constant 0 : i32
    %c0_i32_1 = arith.constant 0 : i32
    return %c0_i32, %c0_i32_0 : i32, i32
  }
  func.func @transform_7(%arg0: i32) -> (i32, i32) {
    %c0_i32 = arith.constant 0 : i32
    %c0_i32_0 = arith.constant 0 : i32
    %c0_i32_1 = arith.constant 0 : i32
    return %c0_i32, %c0_i32_0 : i32, i32
  }
  func.func @transform_8(%arg0: i32) -> (i32, i32, i32) {
    %c0_i32 = arith.constant 0 : i32
    %c0_i32_0 = arith.constant 0 : i32
    %c0_i32_1 = arith.constant 0 : i32
    return %arg0, %c0_i32, %c0_i32_0 : i32, i32, i32
  }
}

module attributes {stable_mosaic.version = 11 : i64} {
  func.func @_bert_attention_kernel(%arg0: i32, %arg1: memref<1x8x32xf32, #tpu.memory_space<vmem>>, %arg2: memref<1x1x8xf32, #tpu.memory_space<vmem>>, %arg3: memref<32x96xf32, #tpu.memory_space<vmem>>, %arg4: memref<1x96xf32, #tpu.memory_space<vmem>>, %arg5: memref<32x32xf32, #tpu.memory_space<vmem>>, %arg6: memref<1x32xf32, #tpu.memory_space<vmem>>, %arg7: memref<1x32xf32, #tpu.memory_space<vmem>>, %arg8: memref<1x32xf32, #tpu.memory_space<vmem>>, %arg9: memref<1x8x32xf32, #tpu.memory_space<vmem>>) attributes {dimension_semantics = [#tpu.dimension_semantics<parallel>], iteration_bounds = array<i64: 2>, scalar_prefetch = 0 : i64, scratch_operands = 0 : i64, tpu.core_type = #tpu.core_type<tc>, window_params = [{transform_indices = @transform_0, window_bounds = array<i64: 1, 8, 32>}, {transform_indices = @transform_1, window_bounds = array<i64: 1, 1, 8>}, {pipeline_mode = #tpu.pipeline_mode<synchronous>, transform_indices = @transform_2, window_bounds = array<i64: 32, 96>}, {pipeline_mode = #tpu.pipeline_mode<synchronous>, transform_indices = @transform_3, window_bounds = array<i64: 1, 96>}, {pipeline_mode = #tpu.pipeline_mode<synchronous>, transform_indices = @transform_4, window_bounds = array<i64: 32, 32>}, {pipeline_mode = #tpu.pipeline_mode<synchronous>, transform_indices = @transform_5, window_bounds = array<i64: 1, 32>}, {pipeline_mode = #tpu.pipeline_mode<synchronous>, transform_indices = @transform_6, window_bounds = array<i64: 1, 32>}, {pipeline_mode = #tpu.pipeline_mode<synchronous>, transform_indices = @transform_7, window_bounds = array<i64: 1, 32>}, {transform_indices = @transform_8, window_bounds = array<i64: 1, 8, 32>}]} {
    %c0 = arith.constant 0 : index
    %c0_0 = arith.constant 0 : index
    %c0_1 = arith.constant 0 : index
    %0 = vector.load %arg1[%c0, %c0_0, %c0_1] : memref<1x8x32xf32, #tpu.memory_space<vmem>>, vector<1x8x32xf32>
    %1 = vector.shape_cast %0 : vector<1x8x32xf32> to vector<8x32xf32>
    %c0_2 = arith.constant 0 : index
    %c0_3 = arith.constant 0 : index
    %2 = vector.load %arg3[%c0_2, %c0_3] : memref<32x96xf32, #tpu.memory_space<vmem>>, vector<32x96xf32>
    %cst = arith.constant dense<0.000000e+00> : vector<8x96xf32>
    %3 = tpu.matmul %1, %2, %cst {dimension_numbers = #tpu.dot_dimension_numbers<[1], [0], [0], [1], [0, 0, 1, 1], [], []>} : vector<8x32xf32>, vector<32x96xf32>, vector<8x96xf32> -> vector<8x96xf32>
    %c0_4 = arith.constant 0 : index
    %c0_5 = arith.constant 0 : index
    %4 = vector.load %arg4[%c0_4, %c0_5] : memref<1x96xf32, #tpu.memory_space<vmem>>, vector<1x96xf32>
    %5 = vector.broadcast %4 : vector<1x96xf32> to vector<8x96xf32>
    %6 = arith.addf %3, %5 : vector<8x96xf32>
    %7 = vector.extract_strided_slice %6 {offsets = [0, 0], sizes = [8, 32], strides = [1, 1]} : vector<8x96xf32> to vector<8x32xf32>
    %8 = vector.extract_strided_slice %6 {offsets = [0, 32], sizes = [8, 32], strides = [1, 1]} : vector<8x96xf32> to vector<8x32xf32>
    %9 = vector.extract_strided_slice %6 {offsets = [0, 64], sizes = [8, 32], strides = [1, 1]} : vector<8x96xf32> to vector<8x32xf32>
    %c0_6 = arith.constant 0 : index
    %c0_7 = arith.constant 0 : index
    %c0_8 = arith.constant 0 : index
    %10 = vector.load %arg2[%c0_6, %c0_7, %c0_8] : memref<1x1x8xf32, #tpu.memory_space<vmem>>, vector<1x1x8xf32>
    %11 = vector.shape_cast %10 : vector<1x1x8xf32> to vector<1x8xf32>
    %12 = vector.extract_strided_slice %7 {offsets = [0, 0], sizes = [8, 8], strides = [1, 1]} : vector<8x32xf32> to vector<8x8xf32>
    %13 = vector.extract_strided_slice %8 {offsets = [0, 0], sizes = [8, 8], strides = [1, 1]} : vector<8x32xf32> to vector<8x8xf32>
    %14 = vector.extract_strided_slice %9 {offsets = [0, 0], sizes = [8, 8], strides = [1, 1]} : vector<8x32xf32> to vector<8x8xf32>
    %cst_9 = arith.constant dense<0.000000e+00> : vector<8x8xf32>
    %15 = tpu.matmul %12, %13, %cst_9 {dimension_numbers = #tpu.dot_dimension_numbers<[1], [1], [0], [0], [0, 0, 1, 0], [], []>} : vector<8x8xf32>, vector<8x8xf32>, vector<8x8xf32> -> vector<8x8xf32>
    %16 = vector.broadcast %11 : vector<1x8xf32> to vector<8x8xf32>
    %17 = arith.addf %15, %16 : vector<8x8xf32>
    %cst_10 = arith.constant dense<0xFF800000> : vector<8xf32>
    %18 = vector.multi_reduction <maximumf>, %17, %cst_10 [1] : vector<8x8xf32> to vector<8xf32>
    %19 = vector.shape_cast %18 : vector<8xf32> to vector<8x1xf32>
    %20 = vector.broadcast %19 : vector<8x1xf32> to vector<8x8xf32>
    %21 = arith.subf %17, %20 : vector<8x8xf32>
    %22 = math.exp %21 : vector<8x8xf32>
    %cst_11 = arith.constant dense<0.000000e+00> : vector<8xf32>
    %23 = vector.multi_reduction <add>, %22, %cst_11 [1] : vector<8x8xf32> to vector<8xf32>
    %24 = vector.shape_cast %23 : vector<8xf32> to vector<8x1xf32>
    %cst_12 = arith.constant dense<0.000000e+00> : vector<8x8xf32>
    %25 = tpu.matmul %22, %14, %cst_12 {dimension_numbers = #tpu.dot_dimension_numbers<[1], [0], [0], [1], [0, 0, 1, 1], [], []>} : vector<8x8xf32>, vector<8x8xf32>, vector<8x8xf32> -> vector<8x8xf32>
    %26 = tpu.reciprocal %24 {approx = true} : vector<8x1xf32> -> vector<8x1xf32>
    %27 = vector.broadcast %26 : vector<8x1xf32> to vector<8x8xf32>
    %28 = arith.mulf %25, %27 : vector<8x8xf32>
    %29 = vector.extract_strided_slice %7 {offsets = [0, 8], sizes = [8, 8], strides = [1, 1]} : vector<8x32xf32> to vector<8x8xf32>
    %30 = vector.extract_strided_slice %8 {offsets = [0, 8], sizes = [8, 8], strides = [1, 1]} : vector<8x32xf32> to vector<8x8xf32>
    %31 = vector.extract_strided_slice %9 {offsets = [0, 8], sizes = [8, 8], strides = [1, 1]} : vector<8x32xf32> to vector<8x8xf32>
    %cst_13 = arith.constant dense<0.000000e+00> : vector<8x8xf32>
    %32 = tpu.matmul %29, %30, %cst_13 {dimension_numbers = #tpu.dot_dimension_numbers<[1], [1], [0], [0], [0, 0, 1, 0], [], []>} : vector<8x8xf32>, vector<8x8xf32>, vector<8x8xf32> -> vector<8x8xf32>
    %33 = vector.broadcast %11 : vector<1x8xf32> to vector<8x8xf32>
    %34 = arith.addf %32, %33 : vector<8x8xf32>
    %cst_14 = arith.constant dense<0xFF800000> : vector<8xf32>
    %35 = vector.multi_reduction <maximumf>, %34, %cst_14 [1] : vector<8x8xf32> to vector<8xf32>
    %36 = vector.shape_cast %35 : vector<8xf32> to vector<8x1xf32>
    %37 = vector.broadcast %36 : vector<8x1xf32> to vector<8x8xf32>
    %38 = arith.subf %34, %37 : vector<8x8xf32>
    %39 = math.exp %38 : vector<8x8xf32>
    %cst_15 = arith.constant dense<0.000000e+00> : vector<8xf32>
    %40 = vector.multi_reduction <add>, %39, %cst_15 [1] : vector<8x8xf32> to vector<8xf32>
    %41 = vector.shape_cast %40 : vector<8xf32> to vector<8x1xf32>
    %cst_16 = arith.constant dense<0.000000e+00> : vector<8x8xf32>
    %42 = tpu.matmul %39, %31, %cst_16 {dimension_numbers = #tpu.dot_dimension_numbers<[1], [0], [0], [1], [0, 0, 1, 1], [], []>} : vector<8x8xf32>, vector<8x8xf32>, vector<8x8xf32> -> vector<8x8xf32>
    %43 = tpu.reciprocal %41 {approx = true} : vector<8x1xf32> -> vector<8x1xf32>
    %44 = vector.broadcast %43 : vector<8x1xf32> to vector<8x8xf32>
    %45 = arith.mulf %42, %44 : vector<8x8xf32>
    %46 = vector.extract_strided_slice %7 {offsets = [0, 16], sizes = [8, 8], strides = [1, 1]} : vector<8x32xf32> to vector<8x8xf32>
    %47 = vector.extract_strided_slice %8 {offsets = [0, 16], sizes = [8, 8], strides = [1, 1]} : vector<8x32xf32> to vector<8x8xf32>
    %48 = vector.extract_strided_slice %9 {offsets = [0, 16], sizes = [8, 8], strides = [1, 1]} : vector<8x32xf32> to vector<8x8xf32>
    %cst_17 = arith.constant dense<0.000000e+00> : vector<8x8xf32>
    %49 = tpu.matmul %46, %47, %cst_17 {dimension_numbers = #tpu.dot_dimension_numbers<[1], [1], [0], [0], [0, 0, 1, 0], [], []>} : vector<8x8xf32>, vector<8x8xf32>, vector<8x8xf32> -> vector<8x8xf32>
    %50 = vector.broadcast %11 : vector<1x8xf32> to vector<8x8xf32>
    %51 = arith.addf %49, %50 : vector<8x8xf32>
    %cst_18 = arith.constant dense<0xFF800000> : vector<8xf32>
    %52 = vector.multi_reduction <maximumf>, %51, %cst_18 [1] : vector<8x8xf32> to vector<8xf32>
    %53 = vector.shape_cast %52 : vector<8xf32> to vector<8x1xf32>
    %54 = vector.broadcast %53 : vector<8x1xf32> to vector<8x8xf32>
    %55 = arith.subf %51, %54 : vector<8x8xf32>
    %56 = math.exp %55 : vector<8x8xf32>
    %cst_19 = arith.constant dense<0.000000e+00> : vector<8xf32>
    %57 = vector.multi_reduction <add>, %56, %cst_19 [1] : vector<8x8xf32> to vector<8xf32>
    %58 = vector.shape_cast %57 : vector<8xf32> to vector<8x1xf32>
    %cst_20 = arith.constant dense<0.000000e+00> : vector<8x8xf32>
    %59 = tpu.matmul %56, %48, %cst_20 {dimension_numbers = #tpu.dot_dimension_numbers<[1], [0], [0], [1], [0, 0, 1, 1], [], []>} : vector<8x8xf32>, vector<8x8xf32>, vector<8x8xf32> -> vector<8x8xf32>
    %60 = tpu.reciprocal %58 {approx = true} : vector<8x1xf32> -> vector<8x1xf32>
    %61 = vector.broadcast %60 : vector<8x1xf32> to vector<8x8xf32>
    %62 = arith.mulf %59, %61 : vector<8x8xf32>
    %63 = vector.extract_strided_slice %7 {offsets = [0, 24], sizes = [8, 8], strides = [1, 1]} : vector<8x32xf32> to vector<8x8xf32>
    %64 = vector.extract_strided_slice %8 {offsets = [0, 24], sizes = [8, 8], strides = [1, 1]} : vector<8x32xf32> to vector<8x8xf32>
    %65 = vector.extract_strided_slice %9 {offsets = [0, 24], sizes = [8, 8], strides = [1, 1]} : vector<8x32xf32> to vector<8x8xf32>
    %cst_21 = arith.constant dense<0.000000e+00> : vector<8x8xf32>
    %66 = tpu.matmul %63, %64, %cst_21 {dimension_numbers = #tpu.dot_dimension_numbers<[1], [1], [0], [0], [0, 0, 1, 0], [], []>} : vector<8x8xf32>, vector<8x8xf32>, vector<8x8xf32> -> vector<8x8xf32>
    %67 = vector.broadcast %11 : vector<1x8xf32> to vector<8x8xf32>
    %68 = arith.addf %66, %67 : vector<8x8xf32>
    %cst_22 = arith.constant dense<0xFF800000> : vector<8xf32>
    %69 = vector.multi_reduction <maximumf>, %68, %cst_22 [1] : vector<8x8xf32> to vector<8xf32>
    %70 = vector.shape_cast %69 : vector<8xf32> to vector<8x1xf32>
    %71 = vector.broadcast %70 : vector<8x1xf32> to vector<8x8xf32>
    %72 = arith.subf %68, %71 : vector<8x8xf32>
    %73 = math.exp %72 : vector<8x8xf32>
    %cst_23 = arith.constant dense<0.000000e+00> : vector<8xf32>
    %74 = vector.multi_reduction <add>, %73, %cst_23 [1] : vector<8x8xf32> to vector<8xf32>
    %75 = vector.shape_cast %74 : vector<8xf32> to vector<8x1xf32>
    %cst_24 = arith.constant dense<0.000000e+00> : vector<8x8xf32>
    %76 = tpu.matmul %73, %65, %cst_24 {dimension_numbers = #tpu.dot_dimension_numbers<[1], [0], [0], [1], [0, 0, 1, 1], [], []>} : vector<8x8xf32>, vector<8x8xf32>, vector<8x8xf32> -> vector<8x8xf32>
    %77 = tpu.reciprocal %75 {approx = true} : vector<8x1xf32> -> vector<8x1xf32>
    %78 = vector.broadcast %77 : vector<8x1xf32> to vector<8x8xf32>
    %79 = arith.mulf %76, %78 : vector<8x8xf32>
    %80 = tpu.concatenate %28, %45, %62, %79 in 1 : vector<8x8xf32>, vector<8x8xf32>, vector<8x8xf32>, vector<8x8xf32> -> vector<8x32xf32>
    %c0_25 = arith.constant 0 : index
    %c0_26 = arith.constant 0 : index
    %81 = vector.load %arg5[%c0_25, %c0_26] : memref<32x32xf32, #tpu.memory_space<vmem>>, vector<32x32xf32>
    %cst_27 = arith.constant dense<0.000000e+00> : vector<8x32xf32>
    %82 = tpu.matmul %80, %81, %cst_27 {dimension_numbers = #tpu.dot_dimension_numbers<[1], [0], [0], [1], [0, 0, 1, 1], [], []>} : vector<8x32xf32>, vector<32x32xf32>, vector<8x32xf32> -> vector<8x32xf32>
    %c0_28 = arith.constant 0 : index
    %c0_29 = arith.constant 0 : index
    %83 = vector.load %arg6[%c0_28, %c0_29] : memref<1x32xf32, #tpu.memory_space<vmem>>, vector<1x32xf32>
    %84 = vector.broadcast %83 : vector<1x32xf32> to vector<8x32xf32>
    %85 = arith.addf %82, %84 : vector<8x32xf32>
    %86 = arith.addf %85, %1 : vector<8x32xf32>
    %cst_30 = arith.constant dense<0.000000e+00> : vector<8xf32>
    %87 = vector.multi_reduction <add>, %86, %cst_30 [1] : vector<8x32xf32> to vector<8xf32>
    %88 = vector.shape_cast %87 : vector<8xf32> to vector<8x1xf32>
    %cst_31 = arith.constant 3.200000e+01 : f32
    %89 = vector.broadcast %cst_31 : f32 to vector<8x1xf32>
    %90 = arith.divf %88, %89 : vector<8x1xf32>
    %91 = vector.broadcast %90 : vector<8x1xf32> to vector<8x32xf32>
    %92 = arith.subf %86, %91 : vector<8x32xf32>
    %93 = arith.mulf %92, %92 : vector<8x32xf32>
    %cst_32 = arith.constant dense<0.000000e+00> : vector<8xf32>
    %94 = vector.multi_reduction <add>, %93, %cst_32 [1] : vector<8x32xf32> to vector<8xf32>
    %95 = vector.shape_cast %94 : vector<8xf32> to vector<8x1xf32>
    %cst_33 = arith.constant 3.200000e+01 : f32
    %96 = vector.broadcast %cst_33 : f32 to vector<8x1xf32>
    %97 = arith.divf %95, %96 : vector<8x1xf32>
    %cst_34 = arith.constant 9.99999996E-13 : f32
    %98 = vector.broadcast %cst_34 : f32 to vector<8x1xf32>
    %99 = arith.addf %97, %98 : vector<8x1xf32>
    %100 = math.rsqrt %99 : vector<8x1xf32>
    %101 = vector.broadcast %100 : vector<8x1xf32> to vector<8x32xf32>
    %102 = arith.mulf %92, %101 : vector<8x32xf32>
    %c0_35 = arith.constant 0 : index
    %c0_36 = arith.constant 0 : index
    %103 = vector.load %arg7[%c0_35, %c0_36] : memref<1x32xf32, #tpu.memory_space<vmem>>, vector<1x32xf32>
    %104 = vector.broadcast %103 : vector<1x32xf32> to vector<8x32xf32>
    %105 = arith.mulf %102, %104 : vector<8x32xf32>
    %c0_37 = arith.constant 0 : index
    %c0_38 = arith.constant 0 : index
    %106 = vector.load %arg8[%c0_37, %c0_38] : memref<1x32xf32, #tpu.memory_space<vmem>>, vector<1x32xf32>
    %107 = vector.broadcast %106 : vector<1x32xf32> to vector<8x32xf32>
    %108 = arith.addf %105, %107 : vector<8x32xf32>
    %c0_39 = arith.constant 0 : index
    %c0_40 = arith.constant 0 : index
    %c0_41 = arith.constant 0 : index
    %109 = vector.load %arg9[%c0_39, %c0_40, %c0_41] : memref<1x8x32xf32, #tpu.memory_space<vmem>>, vector<1x8x32xf32>
    %110 = vector.shape_cast %109 : vector<1x8x32xf32> to vector<8x32xf32>
    %111 = vector.shape_cast %108 : vector<8x32xf32> to vector<1x8x32xf32>
    tpu.vector_store %arg9[%c0_39, %c0_40, %c0_41], %111 {strides = array<i32>} : memref<1x8x32xf32, #tpu.memory_space<vmem>>, vector<1x8x32xf32>,
    return
  }
  func.func @transform_0(%arg0: i32) -> (i32, i32, i32) {
    %c0_i32 = arith.constant 0 : i32
    %c0_i32_0 = arith.constant 0 : i32
    %c0_i32_1 = arith.constant 0 : i32
    return %arg0, %c0_i32, %c0_i32_0 : i32, i32, i32
  }
  func.func @transform_1(%arg0: i32) -> (i32, i32, i32) {
    %c0_i32 = arith.constant 0 : i32
    %c0_i32_0 = arith.constant 0 : i32
    %c0_i32_1 = arith.constant 0 : i32
    return %arg0, %c0_i32, %c0_i32_0 : i32, i32, i32
  }
  func.func @transform_2(%arg0: i32) -> (i32, i32) {
    %c0_i32 = arith.constant 0 : i32
    %c0_i32_0 = arith.constant 0 : i32
    %c0_i32_1 = arith.constant 0 : i32
    return %c0_i32, %c0_i32_0 : i32, i32
  }
  func.func @transform_3(%arg0: i32) -> (i32, i32) {
    %c0_i32 = arith.constant 0 : i32
    %c0_i32_0 = arith.constant 0 : i32
    %c0_i32_1 = arith.constant 0 : i32
    return %c0_i32, %c0_i32_0 : i32, i32
  }
  func.func @transform_4(%arg0: i32) -> (i32, i32) {
    %c0_i32 = arith.constant 0 : i32
    %c0_i32_0 = arith.constant 0 : i32
    %c0_i32_1 = arith.constant 0 : i32
    return %c0_i32, %c0_i32_0 : i32, i32
  }
  func.func @transform_5(%arg0: i32) -> (i32, i32) {
    %c0_i32 = arith.constant 0 : i32
    %c0_i32_0 = arith.constant 0 : i32
    %c0_i32_1 = arith.constant 0 : i32
    return %c0_i32, %c0_i32_0 : i32, i32
  }
  func.func @transform_6(%arg0: i32) -> (i32, i32) {
    %c0_i32 = arith.constant 0 : i32
    %c0_i32_0 = arith.constant 0 : i32
    %c0_i32_1 = arith.constant 0 : i32
    return %c0_i32, %c0_i32_0 : i32, i32
  }
  func.func @transform_7(%arg0: i32) -> (i32, i32) {
    %c0_i32 = arith.constant 0 : i32
    %c0_i32_0 = arith.constant 0 : i32
    %c0_i32_1 = arith.constant 0 : i32
    return %c0_i32, %c0_i32_0 : i32, i32
  }
  func.func @transform_8(%arg0: i32) -> (i32, i32, i32) {
    %c0_i32 = arith.constant 0 : i32
    %c0_i32_0 = arith.constant 0 : i32
    %c0_i32_1 = arith.constant 0 : i32
    return %arg0, %c0_i32, %c0_i32_0 : i32, i32, i32
  }
}

</mosaic_0001>

<bundles_post_ra>
// kernel: tpu_custom_call.1
= control target key start
LH: loop header
LB: loop body
LE: loop exit
PB: predicated region body
PF: predicated region fallthrough
CT: control target
= control target key end

     0   :  { %s2193_s0 = inlined_call_operand.hbm [shape: f32[2,8,32], index: 0, kind: input, shape index: {}]   ;;  %s2194_s1 = inlined_call_operand.hbm [shape: f32[2,1,8], index: 1, kind: input, shape index: {}]   ;;  %s2195_s2 = inlined_call_operand.hbm [shape: f32[32,96], index: 2, kind: input, shape index: {}]   ;;  %s2196_s3 = inlined_call_operand.vmem [shape: f32[1,96], index: 3, kind: input, shape index: {}]   ;;  %s2197_s4 = inlined_call_operand.hbm [shape: f32[32,32], index: 4, kind: input, shape index: {}]   ;;  %s2198_s5 = inlined_call_operand.vmem [shape: f32[1,32], index: 5, kind: input, shape index: {}]   ;;  %s2199_s6 = inlined_call_operand.vmem [shape: f32[1,32], index: 6, kind: input, shape index: {}]   ;;  %s2200_s7 = inlined_call_operand.vmem [shape: f32[1,32], index: 7, kind: input, shape index: {}]   ;;  %s2201_s8 = inlined_call_operand.hbm [shape: f32[2,8,32], index: 8, kind: output, shape index: {}]  }
   0x1   :  { %2207 = sst [smem:[#allocation18_spill]] %s2193_s0 }
   0x2   :  { %2208 = sst [smem:[#allocation19_spill]] %s2195_s2 }
   0x3   :  { %2209 = sst [smem:[#allocation20_spill]] %s2197_s4 }
   0x4   :  { %13 = vsyncpa [#allocation3], 0 }
   0x5   :  { %15 = vsyncpa [#allocation3 + $0x1], 0 }
   0x6   :  { %16 = vsyncpa [#allocation6], 0 }
   0x7   :  { %18 = vsyncpa [#allocation6 + $0x1], 0 }
   0x8   :  { %19 = vsyncpa [#allocation9], 0 }
   0x9   :  { %20 = vsyncpa [#allocation4], 0 }
   0xa   :  { %22 = vsyncpa [#allocation4 + $0x1], 0  ;;  %s1879_s27 = smov 0   ;;  %s1881_s28 = smov 0  }
   0xb   :  { %s1883_s29 = smov 0   ;;  %s1885_s30 = smov 0  }
   0xc LB: > { %2210 = sst [smem:[#allocation16_spill]] %s1805_s29  ;;  %s1900_s9 = sadd.s32 4294967295, %s1809_s30   ;;  %s1809_s30 = sphi %s1885_s30, %s2236_s30   ;;  %s1805_s29 = sphi %s1883_s29, %s2233_s29   ;;  %s1801_s28 = sphi %s1881_s28, %s2235_s28   ;;  %s1797_s27 = sphi %s1879_s27, %s2234_s27  }
   0xd   : > { %s1393_s10 = sadd.s32 4294967294, %s1809_s30   ;;  %p48_p0 = scmp.ne.s32.totalorder %s1801_s28, %s1797_s27 }
   0xe   : > { %p2202_p1 = scmp.eq.s32.totalorder %s1900_s9, 0  ;;  %p230_p3 = scmp.eq.s32.totalorder %s1393_s10, 1 }
   0xf   : > { %p1394_p5 = scmp.ge.s32.totalorder %s1809_s30, 1  ;;  %p237_p7 = scmp.lt.s32.totalorder %s1809_s30, 3 }
  0x10   : > { %p1909_p4 = por %p2202_p1, %p48_p0  ;;  %p1914_p6 = por %p230_p3, %p48_p0 }
  0x11   : > { %p1919_p8 = pnand %p1394_p5, %p237_p7  ;;  %s1811_s14 = smov [#allocation7]  }
  0x12   : > { %s2211_s11 = scalar_select %p1909_p4, 1, 0 }
  0x13   : > { %s2212_s12 = scalar_select %p1914_p6, 1, 0 }
  0x14   : > { %s2213_s13 = scalar_select %p1919_p8, 1, 0 }
  0x15   : > { %s249_s15 = sshll.u32 %s1811_s14, 4  ;;  %p1531_p9 = pneg %p1919_p8  ;;  %s250_s15 = int_to_ptr.vmem [resolvable:$true] %s249_s15 }
  0x16   : > { %s1812_s17 = smov [#allocation8]   ;;  %s1636_s19 = scalar_lea.vmem %s250_s15, 512 }
  0x17   : > { %p1928_p11 = pnand %p1531_p9, %p2202_p1  ;;  %s265_s18 = sshll.u32 %s1812_s17, 4  ;;  %s266_s18 = int_to_ptr.vmem [resolvable:$true] %s265_s18 }
  0x18   : > { %p1637_p13 = scmp.ne.s32.totalorder %s250_s15, %s1636_s19  ;;  %p1644_p5 = scmp.lt.s32.totalorder %s250_s15, %s250_s15 }
  0x19   : > { %p1627_p12 = pneg %p1928_p11  ;;  %p1645_p7 = scmp.lt.s32.totalorder %s1636_s19, %s1636_s19 }
  0x1b   : > { %p1639_p0 = pnand %p1637_p13, %p1627_p12  ;;  %p1646_p10 = por %p1645_p7, %p1644_p5 }
  0x1d   : > { %p1640_p3 = pneg %p1639_p0 }
  0x1f   : > { %p1647_p9 = pnand %p1646_p10, %p1640_p3 }
  0x21   : > { %1650 = shalt.err (!%p1647_p9)
}
  0x22   : > { %s1813_s20 = smov 128   ;;  %s1814_s21 = smov 8  }
  0x23   : > { %s2215_s2 = sld [smem:[#allocation19_spill]]  ;;  %s1662_s24 = scalar_lea.vmem %s266_s18, 512 }
  0x24   : > { %p1663_p1 = scmp.ne.s32.totalorder %s266_s18, %s1662_s24  ;;  %p1670_p2 = scmp.lt.s32.totalorder %s266_s18, %s266_s18 }
  0x25   : > { %p1671_p6 = scmp.lt.s32.totalorder %s1662_s24, %s1662_s24 }
  0x26   : > { %p1665_p13 = pnand %p1663_p1, %p1627_p12 }
  0x27   : > { %p1672_p5 = por %p1671_p6, %p1670_p2 }
  0x28   : > { %p1666_p0 = pneg %p1665_p13 }
  0x29   : > { %1534 = dma.hbm_to_vmem [thread:$0]  (!%p1928_p11), %s2215_s2, 512, %s250_s15, [#allocation6], %s1813_s20, %s1813_s20, %s1814_s21  }
  0x2a   : > { %p1673_p10 = pnand %p1672_p5, %p1666_p0 }
  0x2c   : > { %1676 = shalt.err (!%p1673_p10)
}
  0x2d   : > { %s2216_s4 = sld [smem:[#allocation20_spill]]  ;;  %s1951_s10 = sadd.s32 1, %s1809_s30  }
  0x2e   : > { %s35_s14 = sadd.s32 1, %s1805_s29  ;;  %s32_s15 = ssub.s32 %s1809_s30, %s1951_s10 }
  0x2f   : > { %p42_p1 = scmp.ne.s32.totalorder %s1805_s29, %s1801_s28  ;;  %p33_p2 = scmp.eq.s32.totalorder %s32_s15, 0 }
  0x30   : > { %p43_p6 = scmp.eq.s32.totalorder %s1809_s30, 0  ;;  %p2217_p12 = scmp.eq.s32.totalorder %s1900_s9, 1 }
  0x31   : > { %p1551_p7 = scmp.lt.s32.totalorder %s1809_s30, 2  ;;  %s1970_s19 = sand.u32 1, %s1805_s29  }
  0x32   : > { %p1961_p3 = por %p2217_p12, %p42_p1  ;;  %p44_p9 = por %p43_p6, %p42_p1 }
  0x33   : > { %1537 = dma.hbm_to_vmem [thread:$0]  (!%p1928_p11), %s2216_s4, 512, %s266_s18, [#allocation9], %s1813_s20, %s1813_s20, %s1814_s21  }
  0x34   : > { %s2218_s16 = scalar_select %p1961_p3, 1, 0 }
  0x35   : > { %s1967_s17 = scalar_select %p33_p2, %s1805_s29, %s35_s14  }
  0x36   : > { %s1398_s18 = sshll.u32 %s1970_s19, 3  ;;  %s1399_s20 = sshll.u32 %s1809_s30, 7 }
  0x37   : > { %2219 = sst [smem:[#allocation17_spill]] %s1967_s17  ;;  %s292_s24 = scalar_lea.vmem [#allocation2], %s1398_s18 }
  0x38   : > { %s2220_s0 = sld [smem:[#allocation18_spill]]  ;;  %s299_s25 = sshll.u32 %s292_s24, 4  ;;  %s1979_s25 = int_to_ptr.vmem [resolvable:$true] %s299_s25 }
  0x39   : > { %p1981_p11 = pnand %p1551_p7, %p44_p9  ;;  %s289_s15 = scalar_lea.sflag [#allocation3], %s1970_s19 }
  0x3b   : > { %p1679_p0 = pneg %p1981_p11 }
  0x3e   : > { %s1977_s23 = scalar_lea.hbm %s2220_s0, %s1399_s20  ;;  %s1682_s21 = scalar_lea.hbm %s2220_s0, 256 }
  0x3f   : > { %s1677_s2 = scalar_lea.hbm %s1977_s23, 128  ;;  %p1683_p1 = scmp.lt.s32.totalorder %s1977_s23, %s2220_s0 }
  0x40   : > { %p1678_p13 = scmp.ne.s32.totalorder %s1977_s23, %s1677_s2  ;;  %p1684_p2 = scmp.lt.s32.totalorder %s1682_s21, %s1677_s2 }
  0x42   : > { %p1680_p5 = pnand %p1679_p0, %p1678_p13  ;;  %p1685_p6 = por %p1684_p2, %p1683_p1 }
  0x44   : > { %p1681_p10 = pneg %p1680_p5 }
  0x46   : > { %p1686_p12 = pnand %p1685_p6, %p1681_p10 }
  0x48   : > { %1689 = shalt.err (!%p1686_p12)
}
  0x49   : > { %s1690_s14 = scalar_lea.vmem %s1979_s25, 128  ;;  %s1815_s18 = smov [#allocation2]  }
  0x4a   : > { %p1691_p7 = scmp.ne.s32.totalorder %s1979_s25, %s1690_s14  ;;  %s1695_s20 = sshll.u32 %s1815_s18, 4  ;;  %s1696_s20 = int_to_ptr.vmem [resolvable:$false] %s1695_s20 }
  0x4b   : > { %s1697_s4 = scalar_lea.vmem %s1696_s20, 256  ;;  %p1698_p5 = scmp.lt.s32.totalorder %s1979_s25, %s1696_s20 }
  0x4c   : > { %p1693_p9 = pnand %p1691_p7, %p1679_p0  ;;  %p1699_p3 = scmp.lt.s32.totalorder %s1697_s4, %s1690_s14 }
  0x4e   : > { %p1694_p13 = pneg %p1693_p9  ;;  %p1700_p4 = por %p1699_p3, %p1698_p5 }
  0x50   : > { %p1701_p1 = pnand %p1700_p4, %p1694_p13 }
  0x52   : > { %1704 = shalt.err (!%p1701_p1)
}
  0x53   : > { %1541 = dma.hbm_to_vmem [thread:$0]  (!%p1981_p11), %s1977_s23, 128, %s1979_s25, %s289_s15  }
  0x54   : > { %s1400_s2 = sshll.u32 %s1809_s30, 4  ;;  %s309_s21 = scalar_lea.vmem [#allocation5], %s1970_s19 }
  0x55   : > { %s316_s22 = sshll.u32 %s309_s21, 4  ;;  %s314_s20 = scalar_lea.hbm %s2194_s1, %s1400_s2  ;;  %s317_s22 = int_to_ptr.vmem [resolvable:$true] %s316_s22 }
  0x56   : > { %s2222_s4 = sand.u32 1, %s1809_s30   ;;  %s1705_s0 = scalar_lea.hbm %s314_s20, 16 }
  0x57   : > { %s307_s14 = scalar_lea.sflag [#allocation6], %s2222_s4  ;;  %p1706_p4 = scmp.ne.s32.totalorder %s314_s20, %s1705_s0 }
  0x58   : > { %s1710_s23 = scalar_lea.hbm %s2194_s1, 32  ;;  %p1711_p2 = scmp.lt.s32.totalorder %s314_s20, %s2194_s1 }
  0x59   : > { %p1708_p3 = pnand %p1706_p4, %p1679_p0  ;;  %p1712_p6 = scmp.lt.s32.totalorder %s1710_s23, %s1705_s0 }
  0x5b   : > { %p1709_p10 = pneg %p1708_p3  ;;  %p1713_p12 = por %p1712_p6, %p1711_p2 }
  0x5d   : > { %p1714_p7 = pnand %p1713_p12, %p1709_p10 }
  0x5f   : > { %1717 = shalt.err (!%p1714_p7)
}
  0x60   : > { %s1718_s15 = scalar_lea.vmem %s317_s22, 16  ;;  %s1816_s2 = smov [#allocation5]  }
  0x61   : > { %p1719_p9 = scmp.ne.s32.totalorder %s317_s22, %s1718_s15  ;;  %s1723_s21 = sshll.u32 %s1816_s2, 4  ;;  %s1724_s21 = int_to_ptr.vmem [resolvable:$false] %s1723_s21 }
  0x62   : > { %s1725_s29 = scalar_lea.vmem %s1724_s21, 32  ;;  %p1726_p1 = scmp.lt.s32.totalorder %s317_s22, %s1724_s21 }
  0x63   : > { %p1721_p13 = pnand %p1719_p9, %p1679_p0  ;;  %p1727_p4 = scmp.lt.s32.totalorder %s1725_s29, %s1718_s15 }
  0x65   : > { %p1722_p5 = pneg %p1721_p13  ;;  %p1728_p3 = por %p1727_p4, %p1726_p1 }
  0x67   : > { %p1729_p8 = pnand %p1728_p3, %p1722_p5 }
  0x69   : > { %1732 = shalt.err (!%p1729_p8)
}
  0x6a   : > { %1544 = dma.hbm_to_vmem [thread:$0]  (!%p1981_p11), %s314_s20, 16, %s317_s22, %s307_s14  }
  0x6b   : > { %p2223_p10 = scmp.ne.s32.totalorder %s2213_s13, 0 }
  0x6c   : > { %s2035_s0 = sand.u32 (!%p2223_p10), 1, %s1801_s28   ;;  %p2224_p0 = scmp.ne.s32.totalorder (!%p2223_p10), %s2211_s11, 0 }
  0x6d   : > { %325 = sbr.rel (%p2223_p10) target bundleno = 1992 (0x7c8), region = 52  ;;  %s1402_s17 = sshll.u32 (!%p2223_p10), %s2035_s0, 3 }
  0x6e   : > { %s328_s24 = scalar_lea.sflag (!%p2223_p10), [#allocation3], %s2035_s0  ;;  %s331_s18 = scalar_lea.vmem (!%p2223_p10), [#allocation2], %s1402_s17 }
  0x72   : > { %1776 = dma.done.wait (%p2224_p0), %s328_s24, 128  }
  0x73   : > { %1778 = vsyncadd (%p2224_p0), %s328_s24, 4294967168  ;;  %s336_s13 = sand.u32 1, %s1900_s9   ;;  %s339_s22 = scalar_lea.vmem [#allocation5], %s2035_s0 }
  0x74   : > { %s337_s26 = scalar_lea.sflag [#allocation6], %s336_s13 }
  0x75   : > { %1780 = dma.done.wait (%p2224_p0), %s337_s26, 16  }
  0x76   : > { %1782 = vsyncadd (%p2224_p0), %s337_s26, 4294967280  ;;  %p2225_p8 = scmp.eq.s32.totalorder %s1900_s9, 0 }
  0x78   : > { %1784 = dma.done.wait (%p2225_p8), [#allocation6], 512   ;;  %p2226_p11 = pmov %p2225_p8 }
  0x79   : > { %p2227_p2 = pmov %p2225_p8 }
  0x7a   : > { %1786 = vsyncadd (%p2226_p11), [#allocation6], 4294966784 }
  0x7b   : > { %1788 = dma.done.wait (%p2227_p2), [#allocation9], 512   ;;  %p2228_p6 = pmov %p2227_p2 }
  0x7c   : > { %v1817_v0 = vmov 0.0   ;;  %vm1818_vm0 = vmmov 0   ;;  %v388_v1 = vld [vmem:[#allocation7 + $0x18] sm:$0xff]  ;;  %v387_v2 = vld [vmem:[#allocation7 + $0x10] sm:$0xff]  ;;  %v386_v3 = vld [vmem:[#allocation7 + $0x8] sm:$0xff]  ;;  %vm396_vm1 = vcmask 261120  }
  0x7d   : > { %1790 = vsyncadd (%p2228_p6), [#allocation9], 4294966784  ;;  %1455 = vmatprep.subr.mxu0 %v1817_v0  ;;  %1463 = vmatprep.mubr.msk.f32.mxu0 %vm1818_vm0, %v1817_v0  ;;  %v385_v4 = vld [vmem:[#allocation7] sm:$0xff]  ;;  %v2067_v5 = vld [vmem:[%s331_s18] sm:$0xff]  ;;  %s1819_s4 = smov 64   ;;  %s1820_s14 = smov 96  }
  0x7e   : > { %1466 = vmatprep.subr.mxu1 %v1817_v0  ;;  %1468 = vmatprep.mubr.msk.f32.mxu1 %vm1818_vm0, %v1817_v0  ;;  %v1406_v6 = vld [vmem:[%s2196_s3] ss:$0 sm:$0xff]  ;;  %s1821_s23 = smov 88   ;;  %s1822_s25 = smov 120   ;;  %vm480_vm2 = vcmask 64512   ;;  %v1157_v62 = vld [vmem:[#allocation8 + $0x18] sm:$0xff] }
  0x7f   : > { %1456 = vmatpush3.msra.mxu0 %v388_v1  ;;  %s1823_s19 = smov 80   ;;  %s1824_s15 = smov 112   ;;  %v1408_v18 = vld [vmem:[%s339_s22] ss:$0 sm:$0xff]  ;;  %v1156_v1 = vld [vmem:[#allocation8 + $0x10] sm:$0xff]  ;;  %vm1150_vm3 = vcmask 130048  }
  0x80   : > { %1457 = vmatprep.subr.mxu0 %v1817_v0  ;;  %s1825_s2 = smov 72   ;;  %s1826_s21 = smov 104   ;;  %vm1152_vm4 = vcmask 195584  }
  0x81   : > { %1458 = vmatpush3.msra.mxu0 %v387_v2  ;;  %s1827_s29 = smov 56   ;;  %s1828_s24 = smov 40   ;;  %v1155_v2 = vld [vmem:[#allocation8 + $0x8] sm:$0xff] }
  0x82   : > { %1459 = vmatprep.subr.mxu0 %v1817_v0  ;;  %s1829_s18 = smov 48   ;;  %s1830_s13 = smov 8  }
  0x83   : > { %1460 = vmatpush3.msra.mxu0 %v386_v3  ;;  %v1154_v3 = vld [vmem:[#allocation8] sm:$0xff]  ;;  %s1831_s26 = smov 16   ;;  %s1832_s22 = smov 24  }
  0x84   : > { %1461 = vmatprep.subr.mxu0 %v1817_v0  ;;  %p2229_p7 = scmp.ne.s32.totalorder %s2218_s16, 0 }
  0x85   : > { %1462 = vmatpush3.msra.mxu0 %v385_v4 }
  0x86   : > { %1464 = vmatmul.mubr.msk.f32.vlgmr.msra.gmra.mxu0 %vm396_vm1, %v2067_v5  ;;  %1486 = vmatprep.subr.mxu0 %v1817_v0 }
  0x87   : > { %1488 = vmatprep.mubr.msk.f32.mxu0 %vm1818_vm0, %v1817_v0 }
 0x146   : > { %v466_v7 = vpop.f32.mrf.mxu0 }
 0x147   : > { %v2078_v8 = vadd.f32 %v1406_v6, %v466_v7 }
 0x148   : > { %v1465_v9 = vpop.f32.mrf.mxu0 }
 0x149   : > { %564 = vrot.lane.b32.xlu1 %v2078_v8, %s1819_s4  ;;  %478 = vrot.lane.b32.xlu0 %v2078_v8, %s1820_s14 }
 0x14d   : > { %644 = vrot.lane.b32.xlu1 %v2078_v8, %s1821_s23 }
 0x151   : > { %642 = vrot.lane.b32.xlu1 %v2078_v8, %s1822_s25 }
 0x155   : > { %809 = vrot.lane.b32.xlu1 %v2078_v8, %s1823_s19  ;;  %s1426_s19 = sshll.u32 %s1900_s9, 7 }
 0x159   : > { %807 = vrot.lane.b32.xlu1 %v2078_v8, %s1824_s15  ;;  %s383_s15 = scalar_lea.vmem [#allocation10], %s1402_s17 }
 0x15d   : > { %974 = vrot.lane.b32.xlu1 %v2078_v8, %s1825_s2  ;;  %s1284_s2 = sshll.u32 %s383_s15, 4  ;;  %s1285_s2 = int_to_ptr.vmem [resolvable:$true] %s1284_s2 }
 0x161   : > { %972 = vrot.lane.b32.xlu1 %v2078_v8, %s1826_s21 }
 0x1bb   : > { %v565_v10 = vpop.permute.xlu1 %564  ;;  %v479_v11 = vpop.permute.xlu0 %478 }
 0x1bc   : > { %1467 = vmatpush3.xpose.msk.msra.mxu1 %vm480_vm2, %v479_v11 }
 0x1bd   : > { %1471 = vmatprep.subr.mxu1 %v1817_v0 }
 0x1bf   : > { %v645_v12 = vpop.permute.xlu1 %644  ;;  %1469 = vmatmul.mubr.msk.f32.vlgmr.msra.gmra.mxu1 %vm480_vm2, %v2078_v8 }
 0x1c0   : > { %1472 = vmatpush3.msra.mxu1 %v565_v10  ;;  %1473 = vmatprep.mubr.msk.f32.mxu1 %vm1818_vm0, %v1817_v0 }
 0x1c1   : > { %1476 = vmatprep.subr.mxu1 %v1817_v0 }
 0x1c3   : > { %v643_v13 = vpop.permute.xlu1 %642 }
 0x1c7   : > { %v810_v14 = vpop.permute.xlu1 %809 }
 0x1c8   : > { %1487 = vmatpush3.xpose.msk.msra.mxu0 %vm480_vm2, %v810_v14 }
 0x1c9   : > { %1496 = vmatprep.subr.mxu0 %v1817_v0 }
 0x1cb   : > { %v808_v15 = vpop.permute.xlu1 %807 }
 0x1cc   : > { %1489 = vmatmul.mubr.msk.f32.vlgmr.msra.gmra.mxu0 %vm480_vm2, %v808_v15 }
 0x1cd   : > { %1498 = vmatprep.mubr.msk.f32.mxu0 %vm1818_vm0, %v1817_v0 }
 0x1cf   : > { %v975_v16 = vpop.permute.xlu1 %974 }
 0x1d0   : > { %1497 = vmatpush3.xpose.msk.msra.mxu0 %vm480_vm2, %v975_v16 }
 0x1d1   : > { %1506 = vmatprep.subr.mxu0 %v1817_v0 }
 0x1d3   : > { %v973_v17 = vpop.permute.xlu1 %972 }
 0x1d4   : > { %1499 = vmatmul.mubr.msk.f32.vlgmr.msra.gmra.mxu0 %vm480_vm2, %v973_v17 }
 0x1d5   : > { %1514 = vmatprep.mubr.msk.f32.mxu0 %vm1818_vm0, %v1817_v0  ;;  %1507 = vmatpush3.msra.mxu0 %v1157_v62 }
 0x1d6   : > { %1508 = vmatprep.subr.mxu0 %v1817_v0 }
 0x1d7   : > { %1509 = vmatpush3.msra.mxu0 %v1156_v1 }
 0x1d8   : > { %1510 = vmatprep.subr.mxu0 %v1817_v0 }
 0x1d9   : > { %1511 = vmatpush3.msra.mxu0 %v1155_v2 }
 0x1da   : > { %1512 = vmatprep.subr.mxu0 %v1817_v0 }
 0x1db   : > { %1513 = vmatpush3.msra.mxu0 %v1154_v3 }
 0x27f   : > { %v551_v19 = vpop.f32.mrf.mxu1 }
 0x280   : > { %v552_v20 = vadd.f32 %v1408_v18, %v551_v19 }
 0x281   : > { %v1470_v21 = vpop.f32.mrf.mxu1 }
 0x282   : > { %v555_v22 = vsel %vm480_vm2, %v552_v20, -inf }
 0x283   : > { %556 = vmax.xlane.f32.xlu0 %v555_v22 }
 0x28c   : > { %v881_v23 = vpop.f32.mrf.mxu0 }
 0x28d   : > { %v882_v27 = vadd.f32 %v1408_v18, %v881_v23 }
 0x28e   : > { %v1490_v24 = vpop.f32.mrf.mxu0 }
 0x28f   : > { %v885_v29 = vsel %vm480_vm2, %v882_v27, -inf }
 0x294   : > { %v1046_v25 = vpop.f32.mrf.mxu0 }
 0x295   : > { %v1047_v28 = vadd.f32 %v1408_v18, %v1046_v25  ;;  %v1421_v25 = vld [vmem:[%s2198_s5] ss:$0 sm:$0xff] }
 0x296   : > { %v1500_v26 = vpop.f32.mrf.mxu0 }
 0x297   : > { %v1050_v30 = vsel %vm480_vm2, %v1047_v28, -inf }
 0x299   : > { %729 = vrot.lane.b32.xlu0 %v2078_v8, %s1827_s29 }
 0x2b8   : > { %886 = vmax.xlane.f32.xlu0 %v885_v29 }
 0x2bc   : > { %1051 = vmax.xlane.f32.xlu0 %v1050_v30 }
 0x2d2   : > { %1059 = vrot.lane.b32.xlu0 %v2078_v8, %s1828_s24  ;;  %s1282_s24 = scalar_lea.hbm %s2201_s8, %s1426_s19 }
 0x30c   : > { %v557_v31 = vpop.xlane.xlu0 %556 }
 0x30d   : > { %v558_v32 = vsub.f32 %v552_v20, %v557_v31 }
 0x30f   : > { %v559_v33 = vmul.f32 1.442695, %v558_v32 }
 0x310   : > { %v730_v35 = vpop.permute.xlu0 %729 }
 0x311   : > { %1607 = vpow2.f32 %v559_v33 }
 0x31e   : > { %v1608_v34 = vpop.eup %1607 }
 0x31f   : > { %1474 = vmatmul.mubr.msk.f32.vlgmr.msra.gmra.mxu1 %vm480_vm2, %v1608_v34  ;;  %v561_v59 = vsel %vm480_vm2, %v1608_v34, 0.0 }
 0x320   : > { %1477 = vmatpush3.xpose.msk.msra.mxu1 %vm480_vm2, %v645_v12  ;;  %1478 = vmatprep.mubr.msk.f32.mxu1 %vm1818_vm0, %v1817_v0 }
 0x321   : > { %1481 = vmatprep.subr.mxu1 %v1817_v0 }
 0x323   : > { %1479 = vmatmul.mubr.msk.f32.vlgmr.msra.gmra.mxu1 %vm480_vm2, %v643_v13 }
 0x324   : > { %1482 = vmatpush3.msra.mxu1 %v730_v35  ;;  %1483 = vmatprep.mubr.msk.f32.mxu1 %vm1818_vm0, %v1817_v0 }
 0x325   : > { %1491 = vmatprep.subr.mxu1 %v1817_v0 }
 0x341   : > { %v887_v42 = vpop.xlane.xlu0 %886 }
 0x342   : > { %v888_v43 = vsub.f32 %v882_v27, %v887_v42 }
 0x344   : > { %v889_v44 = vmul.f32 1.442695, %v888_v43 }
 0x345   : > { %v1052_v47 = vpop.xlane.xlu0 %1051 }
 0x346   : > { %1609 = vpow2.f32 %v889_v44  ;;  %v1053_v48 = vsub.f32 %v1047_v28, %v1052_v47 }
 0x348   : > { %v1054_v51 = vmul.f32 1.442695, %v1053_v48 }
 0x349   : > { %v1060_v57 = vpop.permute.xlu0 %1059 }
 0x353   : > { %v1610_v45 = vpop.eup %1609 }
 0x354   : > { %v891_v46 = vsel %vm480_vm2, %v1610_v45, 0.0 }
 0x3df   : > { %v2121_v36 = vpop.f32.mrf.mxu1 }
 0x3e1   : > { %v1475_v37 = vpop.f32.mrf.mxu1 }
 0x3e3   : > { %v716_v38 = vpop.f32.mrf.mxu1 }
 0x3e4   : > { %v717_v39 = vadd.f32 %v1408_v18, %v716_v38 }
 0x3e5   : > { %v1480_v40 = vpop.f32.mrf.mxu1 }
 0x3e6   : > { %v720_v41 = vsel %vm480_vm2, %v717_v39, -inf }
 0x3e7   : > { %721 = vmax.xlane.f32.xlu1 %v720_v41  ;;  %v1424_v41 = vld [vmem:[%s2200_s7] ss:$0 sm:$0xff] }
 0x3f8   : > { %894 = vrot.lane.b32.xlu1 %v2078_v8, %s1829_s18  ;;  %s1271_s18 = scalar_lea.sflag [#allocation4], %s2035_s0 }
 0x41c   : > { %892 = vadd.xlane.f32.xlu1 %v891_v46 }
 0x470   : > { %v722_v49 = vpop.xlane.xlu1 %721 }
 0x471   : > { %v723_v50 = vsub.f32 %v717_v39, %v722_v49 }
 0x473   : > { %v724_v52 = vmul.f32 1.442695, %v723_v50 }
 0x474   : > { %v895_v54 = vpop.permute.xlu1 %894 }
 0x475   : > { %1611 = vpow2.f32 %v724_v52 }
 0x476   : > { %1613 = vpow2.f32 %v1054_v51 }
 0x482   : > { %v1612_v53 = vpop.eup %1611 }
 0x483   : > { %1484 = vmatmul.mubr.msk.f32.vlgmr.msra.gmra.mxu1 %vm480_vm2, %v1612_v53  ;;  %v726_v55 = vsel %vm480_vm2, %v1612_v53, 0.0  ;;  %v1614_v56 = vpop.eup %1613 }
 0x484   : > { %1492 = vmatpush3.msra.mxu1 %v895_v54  ;;  %727 = vadd.xlane.f32.xlu0 %v726_v55  ;;  %v1056_v58 = vsel %vm480_vm2, %v1614_v56, 0.0 }
 0x485   : > { %1493 = vmatprep.mubr.msk.f32.mxu1 %vm1818_vm0, %v1817_v0  ;;  %1501 = vmatprep.subr.mxu1 %v1817_v0 }
 0x487   : > { %1494 = vmatmul.mubr.msk.f32.vlgmr.msra.gmra.mxu1 %vm480_vm2, %v1610_v45 }
 0x488   : > { %1502 = vmatpush3.msra.mxu1 %v1060_v57  ;;  %1057 = vadd.xlane.f32.xlu0 %v1056_v58 }
 0x489   : > { %1503 = vmatprep.mubr.msk.f32.mxu1 %vm1818_vm0, %v1817_v0 }
 0x48b   : > { %1504 = vmatmul.mubr.msk.f32.vlgmr.msra.gmra.mxu1 %vm480_vm2, %v1614_v56 }
 0x48c   : > { %562 = vadd.xlane.f32.xlu0 %v561_v59 }
 0x4a5   : > { %v893_v61 = vpop.xlane.xlu1 %892 }
 0x50d   : > { %v728_v60 = vpop.xlane.xlu0 %727 }
 0x50e   : > { %1615 = vrcp.f32 %v728_v60 }
 0x50f   : > { %1617 = vrcp.f32 %v893_v61 }
 0x511   : > { %v1058_v63 = vpop.xlane.xlu0 %1057 }
 0x512   : > { %1619 = vrcp.f32 %v1058_v63 }
 0x515   : > { %v563_v0 = vpop.xlane.xlu0 %562 }
 0x516   : > { %1621 = vrcp.f32 %v563_v0 }
 0x51b   : > { %v1616_v4 = vpop.eup %1615 }
 0x51c   : > { %v1618_v9 = vpop.eup %1617 }
 0x51f   : > { %v1620_v13 = vpop.eup %1619 }
 0x523   : > { %v1622_v17 = vpop.eup %1621 }
 0x524   : > { %v641_v19 = vmul.f32 %v1622_v17, %v2121_v36 }
 0x543   : > { %v801_v6 = vpop.f32.mrf.mxu1 }
 0x544   : > { %v806_v7 = vmul.f32 %v1616_v4, %v801_v6 }
 0x545   : > { %v1485_v8 = vpop.f32.mrf.mxu1 }
 0x546   : > { %1138 = vrot.lane.b32.xlu0 %v806_v7, %s1830_s13  ;;  %s1733_s13 = scalar_lea.vmem %s1285_s2, 128 }
 0x547   : > { %v966_v10 = vpop.f32.mrf.mxu1  ;;  %p1734_p12 = scmp.ne.s32.totalorder %s1285_s2, %s1733_s13 }
 0x548   : > { %v971_v11 = vmul.f32 %v1618_v9, %v966_v10 }
 0x549   : > { %v1495_v12 = vpop.f32.mrf.mxu1  ;;  %p1735_p9 = pnand %p1734_p12, %p2229_p7 }
 0x54a   : > { %1142 = vrot.lane.b32.xlu1 %v971_v11, %s1831_s26  ;;  %s1833_s26 = smov [#allocation10]  }
 0x54b   : > { %v1131_v14 = vpop.f32.mrf.mxu1  ;;  %p1736_p13 = pneg %p1735_p9  ;;  %s1737_s9 = sshll.u32 %s1833_s26, 4  ;;  %s1738_s9 = int_to_ptr.vmem [resolvable:$false] %s1737_s9 }
 0x54c   : > { %v1136_v15 = vmul.f32 %v1620_v13, %v1131_v14  ;;  %s1739_s17 = scalar_lea.vmem %s1738_s9, 256  ;;  %p1740_p5 = scmp.lt.s32.totalorder %s1285_s2, %s1738_s9 }
 0x54d   : > { %v1505_v16 = vpop.f32.mrf.mxu1  ;;  %p1741_p1 = scmp.lt.s32.totalorder %s1739_s17, %s1733_s13 }
 0x54e   : > { %1146 = vrot.lane.b32.xlu0 %v1136_v15, %s1832_s22 }
 0x54f   : > { %p1742_p4 = por %p1741_p1, %p1740_p5 }
 0x551   : > { %p1743_p3 = pnand %p1742_p4, %p1736_p13 }
 0x5b8   : > { %v1139_v18 = vpop.permute.xlu0 %1138 }
 0x5b9   : > { %v1149_v21 = vsel %vm480_vm2, %v641_v19, %v1139_v18 }
 0x5bc   : > { %v1143_v20 = vpop.permute.xlu1 %1142 }
 0x5bd   : > { %v1151_v22 = vsel %vm1150_vm3, %v1149_v21, %v1143_v20 }
 0x5c0   : > { %v1147_v23 = vpop.permute.xlu0 %1146 }
 0x5c1   : > { %v1153_v24 = vsel %vm1152_vm4, %v1151_v22, %v1147_v23 }
 0x5c2   : > { %1515 = vmatmul.mubr.msk.f32.vlgmr.msra.gmra.mxu0 %vm396_vm1, %v1153_v24 }
 0x682   : > { %v1234_v26 = vpop.f32.mrf.mxu0 }
 0x683   : > { %v1235_v27 = vadd.f32 %v1421_v25, %v1234_v26 }
 0x684   : > { %v1516_v28 = vpop.f32.mrf.mxu0 }
 0x685   : > { %v1238_v29 = vadd.f32 %v1235_v27, %v2067_v5  ;;  %v1423_v5 = vld [vmem:[%s2199_s6] ss:$0 sm:$0xff] }
 0x687   : > { %v1239_v30 = vsel %vm396_vm1, %v1238_v29, 0.0 }
 0x688   : > { %1240 = vadd.xlane.f32.xlu0 %v1239_v30 }
 0x711   : > { %v1241_v31 = vpop.xlane.xlu0 %1240 }
 0x712   : > { %v1243_v32 = vmul.f32 0.03125, %v1241_v31 }
 0x714   : > { %v1244_v33 = vsub.f32 %v1238_v29, %v1243_v32 }
 0x716   : > { %v1245_v34 = vmul.f32 %v1244_v33, %v1244_v33 }
 0x718   : > { %v1246_v35 = vsel %vm396_vm1, %v1245_v34, 0.0 }
 0x719   : > { %1247 = vadd.xlane.f32.xlu1 %v1246_v35 }
 0x7a2   : > { %v1248_v36 = vpop.xlane.xlu1 %1247 }
 0x7a3   : > { %v1249_v37 = vmul.f32 0.03125, %v1248_v36 }
 0x7a5   : > { %v1250_v38 = vadd.f32 1e-12, %v1249_v37 }
 0x7a7   : > { %1623 = vrsqrt.f32 %v1250_v38 }
 0x7b4   : > { %v1624_v39 = vpop.eup %1623 }
 0x7b5   : > { %v1252_v40 = vmul.f32 %v1624_v39, %v1244_v33 }
 0x7b7   : > { %v1260_v42 = vmul.f32 %v1423_v5, %v1252_v40 }
 0x7b9   : > { %v1268_v43 = vadd.f32 %v1424_v41, %v1260_v42 }
 0x7bb   : > { %1269 = vst.msk [vmem:[%s383_s15] sm:$0xff] %vm396_vm1, %v1268_v43 }
 0x7bc   : > { %1746 = shalt.err (!%p1743_p3)
}
 0x7bd   : > { %s1747_s22 = scalar_lea.hbm %s1282_s24, 128  ;;  %s1751_s20 = scalar_lea.hbm %s2201_s8, 256 }
 0x7be   : > { %p1748_p10 = scmp.ne.s32.totalorder %s1282_s24, %s1747_s22  ;;  %p1752_p11 = scmp.lt.s32.totalorder %s1282_s24, %s2201_s8 }
 0x7bf   : > { %p1753_p2 = scmp.lt.s32.totalorder %s1751_s20, %s1747_s22 }
 0x7c0   : > { %p1749_p0 = pnand %p1748_p10, %p2229_p7 }
 0x7c1   : > { %p1754_p6 = por %p1753_p2, %p1752_p11 }
 0x7c2   : > { %p1750_p8 = pneg %p1749_p0 }
 0x7c4   : > { %p1755_p12 = pnand %p1754_p6, %p1750_p8 }
 0x7c6   : > { %1758 = shalt.err (!%p1755_p12)
}
 0x7c7   : > { %1529 = dma.vmem_to_hbm [thread:$0]  (%p2229_p7), %s1285_s2, 128, %s1282_s24, %s1271_s18  }
 0x7c8 PF: > { %s1296_s23 = sand.u32 1, %s1797_s27   ;;  %p2230_p9 = scmp.ne.s32.totalorder %s2212_s12, 0 }
 0x7c9   : > { %p2231_p13 = scmp.ge.s32.totalorder %s1809_s30, 2  ;;  %s1297_s25 = scalar_lea.sflag [#allocation4], %s1296_s23 }
 0x7cb   : > { %p1546_p5 = pnand %p2231_p13, %p2230_p9 }
 0x7cd   : > { %p1547_p1 = pneg %p1546_p5 }
 0x7cf   : > { %1792 = dma.done.wait (%p1547_p1), %s1297_s25, 128  }
 0x7d0   : > { %1794 = vsyncadd (%p1547_p1), %s1297_s25, 4294967168  ;;  %s2232_s19 = sld [smem:[#allocation16_spill]]  ;;  %p25_p4 = scmp.ge.s32.totalorder %s1951_s10, 4  }
 0x7d1   : > { %s2233_s29 = sld [smem:[#allocation17_spill]]  ;;  %s2234_s27 = smov %s1801_s28 }
 0x7d2   : > { %s2236_s30 = smov %s1951_s10  ;;  %27 = sbr.rel (!%p25_p4) target bundleno = 12 (0xc), region = 118 }
 0x7d6   : > { %s2235_s28 = smov %s2232_s19 }
 0x7d7   :  { %1302 = vsyncpa [#allocation3], 1 }
 0x7d8   :  { %1304 = vsyncpa [#allocation3 + $0x1], 1 }
 0x7d9   :  { %1305 = vsyncpa [#allocation6], 1 }
 0x7da   :  { %1307 = vsyncpa [#allocation6 + $0x1], 1 }
 0x7db   :  { %1308 = vsyncpa [#allocation9], 1 }
 0x7dc   :  { %1309 = vsyncpa [#allocation4], 1 }
 0x7dd   :  { %1311 = vsyncpa [#allocation4 + $0x1], 1 }

// kernel: tpu_custom_call.1
= control target key start
LH: loop header
LB: loop body
LE: loop exit
PB: predicated region body
PF: predicated region fallthrough
CT: control target
= control target key end

     0   :  { %s2193_s0 = inlined_call_operand.hbm [shape: f32[2,8,32], index: 0, kind: input, shape index: {}]   ;;  %s2194_s1 = inlined_call_operand.hbm [shape: f32[2,1,8], index: 1, kind: input, shape index: {}]   ;;  %s2195_s2 = inlined_call_operand.hbm [shape: f32[32,96], index: 2, kind: input, shape index: {}]   ;;  %s2196_s3 = inlined_call_operand.vmem [shape: f32[1,96], index: 3, kind: input, shape index: {}]   ;;  %s2197_s4 = inlined_call_operand.hbm [shape: f32[32,32], index: 4, kind: input, shape index: {}]   ;;  %s2198_s5 = inlined_call_operand.vmem [shape: f32[1,32], index: 5, kind: input, shape index: {}]   ;;  %s2199_s6 = inlined_call_operand.vmem [shape: f32[1,32], index: 6, kind: input, shape index: {}]   ;;  %s2200_s7 = inlined_call_operand.vmem [shape: f32[1,32], index: 7, kind: input, shape index: {}]   ;;  %s2201_s8 = inlined_call_operand.hbm [shape: f32[2,8,32], index: 8, kind: output, shape index: {}]  }
   0x1   :  { %2207 = sst [smem:[#allocation18_spill]] %s2193_s0 }
   0x2   :  { %2208 = sst [smem:[#allocation19_spill]] %s2195_s2 }
   0x3   :  { %2209 = sst [smem:[#allocation20_spill]] %s2197_s4 }
   0x4   :  { %13 = vsyncpa [#allocation3], 0 }
   0x5   :  { %15 = vsyncpa [#allocation3 + $0x1], 0 }
   0x6   :  { %16 = vsyncpa [#allocation6], 0 }
   0x7   :  { %18 = vsyncpa [#allocation6 + $0x1], 0 }
   0x8   :  { %19 = vsyncpa [#allocation9], 0 }
   0x9   :  { %20 = vsyncpa [#allocation4], 0 }
   0xa   :  { %22 = vsyncpa [#allocation4 + $0x1], 0  ;;  %s1879_s27 = smov 0   ;;  %s1881_s28 = smov 0  }
   0xb   :  { %s1883_s29 = smov 0   ;;  %s1885_s30 = smov 0  }
   0xc LB: > { %2210 = sst [smem:[#allocation16_spill]] %s1805_s29  ;;  %s1900_s9 = sadd.s32 4294967295, %s1809_s30   ;;  %s1809_s30 = sphi %s1885_s30, %s2236_s30   ;;  %s1805_s29 = sphi %s1883_s29, %s2233_s29   ;;  %s1801_s28 = sphi %s1881_s28, %s2235_s28   ;;  %s1797_s27 = sphi %s1879_s27, %s2234_s27  }
   0xd   : > { %s1393_s10 = sadd.s32 4294967294, %s1809_s30   ;;  %p48_p0 = scmp.ne.s32.totalorder %s1801_s28, %s1797_s27 }
   0xe   : > { %p2202_p1 = scmp.eq.s32.totalorder %s1900_s9, 0  ;;  %p230_p3 = scmp.eq.s32.totalorder %s1393_s10, 1 }
   0xf   : > { %p1394_p5 = scmp.ge.s32.totalorder %s1809_s30, 1  ;;  %p237_p7 = scmp.lt.s32.totalorder %s1809_s30, 3 }
  0x10   : > { %p1909_p4 = por %p2202_p1, %p48_p0  ;;  %p1914_p6 = por %p230_p3, %p48_p0 }
  0x11   : > { %p1919_p8 = pnand %p1394_p5, %p237_p7  ;;  %s1811_s14 = smov [#allocation7]  }
  0x12   : > { %s2211_s11 = scalar_select %p1909_p4, 1, 0 }
  0x13   : > { %s2212_s12 = scalar_select %p1914_p6, 1, 0 }
  0x14   : > { %s2213_s13 = scalar_select %p1919_p8, 1, 0 }
  0x15   : > { %s249_s15 = sshll.u32 %s1811_s14, 4  ;;  %p1531_p9 = pneg %p1919_p8  ;;  %s250_s15 = int_to_ptr.vmem [resolvable:$true] %s249_s15 }
  0x16   : > { %s1812_s17 = smov [#allocation8]   ;;  %s1636_s19 = scalar_lea.vmem %s250_s15, 512 }
  0x17   : > { %p1928_p11 = pnand %p1531_p9, %p2202_p1  ;;  %s265_s18 = sshll.u32 %s1812_s17, 4  ;;  %s266_s18 = int_to_ptr.vmem [resolvable:$true] %s265_s18 }
  0x18   : > { %p1637_p13 = scmp.ne.s32.totalorder %s250_s15, %s1636_s19  ;;  %p1644_p5 = scmp.lt.s32.totalorder %s250_s15, %s250_s15 }
  0x19   : > { %p1627_p12 = pneg %p1928_p11  ;;  %p1645_p7 = scmp.lt.s32.totalorder %s1636_s19, %s1636_s19 }
  0x1b   : > { %p1639_p0 = pnand %p1637_p13, %p1627_p12  ;;  %p1646_p10 = por %p1645_p7, %p1644_p5 }
  0x1d   : > { %p1640_p3 = pneg %p1639_p0 }
  0x1f   : > { %p1647_p9 = pnand %p1646_p10, %p1640_p3 }
  0x21   : > { %1650 = shalt.err (!%p1647_p9)
}
  0x22   : > { %s1813_s20 = smov 128   ;;  %s1814_s21 = smov 8  }
  0x23   : > { %s2215_s2 = sld [smem:[#allocation19_spill]]  ;;  %s1662_s24 = scalar_lea.vmem %s266_s18, 512 }
  0x24   : > { %p1663_p1 = scmp.ne.s32.totalorder %s266_s18, %s1662_s24  ;;  %p1670_p2 = scmp.lt.s32.totalorder %s266_s18, %s266_s18 }
  0x25   : > { %p1671_p6 = scmp.lt.s32.totalorder %s1662_s24, %s1662_s24 }
  0x26   : > { %p1665_p13 = pnand %p1663_p1, %p1627_p12 }
  0x27   : > { %p1672_p5 = por %p1671_p6, %p1670_p2 }
  0x28   : > { %p1666_p0 = pneg %p1665_p13 }
  0x29   : > { %1534 = dma.hbm_to_vmem [thread:$0]  (!%p1928_p11), %s2215_s2, 512, %s250_s15, [#allocation6], %s1813_s20, %s1813_s20, %s1814_s21  }
  0x2a   : > { %p1673_p10 = pnand %p1672_p5, %p1666_p0 }
  0x2c   : > { %1676 = shalt.err (!%p1673_p10)
}
  0x2d   : > { %s2216_s4 = sld [smem:[#allocation20_spill]]  ;;  %s1951_s10 = sadd.s32 1, %s1809_s30  }
  0x2e   : > { %s35_s14 = sadd.s32 1, %s1805_s29  ;;  %s32_s15 = ssub.s32 %s1809_s30, %s1951_s10 }
  0x2f   : > { %p42_p1 = scmp.ne.s32.totalorder %s1805_s29, %s1801_s28  ;;  %p33_p2 = scmp.eq.s32.totalorder %s32_s15, 0 }
  0x30   : > { %p43_p6 = scmp.eq.s32.totalorder %s1809_s30, 0  ;;  %p2217_p12 = scmp.eq.s32.totalorder %s1900_s9, 1 }
  0x31   : > { %p1551_p7 = scmp.lt.s32.totalorder %s1809_s30, 2  ;;  %s1970_s19 = sand.u32 1, %s1805_s29  }
  0x32   : > { %p1961_p3 = por %p2217_p12, %p42_p1  ;;  %p44_p9 = por %p43_p6, %p42_p1 }
  0x33   : > { %1537 = dma.hbm_to_vmem [thread:$0]  (!%p1928_p11), %s2216_s4, 512, %s266_s18, [#allocation9], %s1813_s20, %s1813_s20, %s1814_s21  }
  0x34   : > { %s2218_s16 = scalar_select %p1961_p3, 1, 0 }
  0x35   : > { %s1967_s17 = scalar_select %p33_p2, %s1805_s29, %s35_s14  }
  0x36   : > { %s1398_s18 = sshll.u32 %s1970_s19, 3  ;;  %s1399_s20 = sshll.u32 %s1809_s30, 7 }
  0x37   : > { %2219 = sst [smem:[#allocation17_spill]] %s1967_s17  ;;  %s292_s24 = scalar_lea.vmem [#allocation2], %s1398_s18 }
  0x38   : > { %s2220_s0 = sld [smem:[#allocation18_spill]]  ;;  %s299_s25 = sshll.u32 %s292_s24, 4  ;;  %s1979_s25 = int_to_ptr.vmem [resolvable:$true] %s299_s25 }
  0x39   : > { %p1981_p11 = pnand %p1551_p7, %p44_p9  ;;  %s289_s15 = scalar_lea.sflag [#allocation3], %s1970_s19 }
  0x3b   : > { %p1679_p0 = pneg %p1981_p11 }
  0x3e   : > { %s1977_s23 = scalar_lea.hbm %s2220_s0, %s1399_s20  ;;  %s1682_s21 = scalar_lea.hbm %s2220_s0, 256 }
  0x3f   : > { %s1677_s2 = scalar_lea.hbm %s1977_s23, 128  ;;  %p1683_p1 = scmp.lt.s32.totalorder %s1977_s23, %s2220_s0 }
  0x40   : > { %p1678_p13 = scmp.ne.s32.totalorder %s1977_s23, %s1677_s2  ;;  %p1684_p2 = scmp.lt.s32.totalorder %s1682_s21, %s1677_s2 }
  0x42   : > { %p1680_p5 = pnand %p1679_p0, %p1678_p13  ;;  %p1685_p6 = por %p1684_p2, %p1683_p1 }
  0x44   : > { %p1681_p10 = pneg %p1680_p5 }
  0x46   : > { %p1686_p12 = pnand %p1685_p6, %p1681_p10 }
  0x48   : > { %1689 = shalt.err (!%p1686_p12)
}
  0x49   : > { %s1690_s14 = scalar_lea.vmem %s1979_s25, 128  ;;  %s1815_s18 = smov [#allocation2]  }
  0x4a   : > { %p1691_p7 = scmp.ne.s32.totalorder %s1979_s25, %s1690_s14  ;;  %s1695_s20 = sshll.u32 %s1815_s18, 4  ;;  %s1696_s20 = int_to_ptr.vmem [resolvable:$false] %s1695_s20 }
  0x4b   : > { %s1697_s4 = scalar_lea.vmem %s1696_s20, 256  ;;  %p1698_p5 = scmp.lt.s32.totalorder %s1979_s25, %s1696_s20 }
  0x4c   : > { %p1693_p9 = pnand %p1691_p7, %p1679_p0  ;;  %p1699_p3 = scmp.lt.s32.totalorder %s1697_s4, %s1690_s14 }
  0x4e   : > { %p1694_p13 = pneg %p1693_p9  ;;  %p1700_p4 = por %p1699_p3, %p1698_p5 }
  0x50   : > { %p1701_p1 = pnand %p1700_p4, %p1694_p13 }
  0x52   : > { %1704 = shalt.err (!%p1701_p1)
}
  0x53   : > { %1541 = dma.hbm_to_vmem [thread:$0]  (!%p1981_p11), %s1977_s23, 128, %s1979_s25, %s289_s15  }
  0x54   : > { %s1400_s2 = sshll.u32 %s1809_s30, 4  ;;  %s309_s21 = scalar_lea.vmem [#allocation5], %s1970_s19 }
  0x55   : > { %s316_s22 = sshll.u32 %s309_s21, 4  ;;  %s314_s20 = scalar_lea.hbm %s2194_s1, %s1400_s2  ;;  %s317_s22 = int_to_ptr.vmem [resolvable:$true] %s316_s22 }
  0x56   : > { %s2222_s4 = sand.u32 1, %s1809_s30   ;;  %s1705_s0 = scalar_lea.hbm %s314_s20, 16 }
  0x57   : > { %s307_s14 = scalar_lea.sflag [#allocation6], %s2222_s4  ;;  %p1706_p4 = scmp.ne.s32.totalorder %s314_s20, %s1705_s0 }
  0x58   : > { %s1710_s23 = scalar_lea.hbm %s2194_s1, 32  ;;  %p1711_p2 = scmp.lt.s32.totalorder %s314_s20, %s2194_s1 }
  0x59   : > { %p1708_p3 = pnand %p1706_p4, %p1679_p0  ;;  %p1712_p6 = scmp.lt.s32.totalorder %s1710_s23, %s1705_s0 }
  0x5b   : > { %p1709_p10 = pneg %p1708_p3  ;;  %p1713_p12 = por %p1712_p6, %p1711_p2 }
  0x5d   : > { %p1714_p7 = pnand %p1713_p12, %p1709_p10 }
  0x5f   : > { %1717 = shalt.err (!%p1714_p7)
}
  0x60   : > { %s1718_s15 = scalar_lea.vmem %s317_s22, 16  ;;  %s1816_s2 = smov [#allocation5]  }
  0x61   : > { %p1719_p9 = scmp.ne.s32.totalorder %s317_s22, %s1718_s15  ;;  %s1723_s21 = sshll.u32 %s1816_s2, 4  ;;  %s1724_s21 = int_to_ptr.vmem [resolvable:$false] %s1723_s21 }
  0x62   : > { %s1725_s29 = scalar_lea.vmem %s1724_s21, 32  ;;  %p1726_p1 = scmp.lt.s32.totalorder %s317_s22, %s1724_s21 }
  0x63   : > { %p1721_p13 = pnand %p1719_p9, %p1679_p0  ;;  %p1727_p4 = scmp.lt.s32.totalorder %s1725_s29, %s1718_s15 }
  0x65   : > { %p1722_p5 = pneg %p1721_p13  ;;  %p1728_p3 = por %p1727_p4, %p1726_p1 }
  0x67   : > { %p1729_p8 = pnand %p1728_p3, %p1722_p5 }
  0x69   : > { %1732 = shalt.err (!%p1729_p8)
}
  0x6a   : > { %1544 = dma.hbm_to_vmem [thread:$0]  (!%p1981_p11), %s314_s20, 16, %s317_s22, %s307_s14  }
  0x6b   : > { %p2223_p10 = scmp.ne.s32.totalorder %s2213_s13, 0 }
  0x6c   : > { %s2035_s0 = sand.u32 (!%p2223_p10), 1, %s1801_s28   ;;  %p2224_p0 = scmp.ne.s32.totalorder (!%p2223_p10), %s2211_s11, 0 }
  0x6d   : > { %325 = sbr.rel (%p2223_p10) target bundleno = 1992 (0x7c8), region = 52  ;;  %s1402_s17 = sshll.u32 (!%p2223_p10), %s2035_s0, 3 }
  0x6e   : > { %s328_s24 = scalar_lea.sflag (!%p2223_p10), [#allocation3], %s2035_s0  ;;  %s331_s18 = scalar_lea.vmem (!%p2223_p10), [#allocation2], %s1402_s17 }
  0x72   : > { %1776 = dma.done.wait (%p2224_p0), %s328_s24, 128  }
  0x73   : > { %1778 = vsyncadd (%p2224_p0), %s328_s24, 4294967168  ;;  %s336_s13 = sand.u32 1, %s1900_s9   ;;  %s339_s22 = scalar_lea.vmem [#allocation5], %s2035_s0 }
  0x74   : > { %s337_s26 = scalar_lea.sflag [#allocation6], %s336_s13 }
  0x75   : > { %1780 = dma.done.wait (%p2224_p0), %s337_s26, 16  }
  0x76   : > { %1782 = vsyncadd (%p2224_p0), %s337_s26, 4294967280  ;;  %p2225_p8 = scmp.eq.s32.totalorder %s1900_s9, 0 }
  0x78   : > { %1784 = dma.done.wait (%p2225_p8), [#allocation6], 512   ;;  %p2226_p11 = pmov %p2225_p8 }
  0x79   : > { %p2227_p2 = pmov %p2225_p8 }
  0x7a   : > { %1786 = vsyncadd (%p2226_p11), [#allocation6], 4294966784 }
  0x7b   : > { %1788 = dma.done.wait (%p2227_p2), [#allocation9], 512   ;;  %p2228_p6 = pmov %p2227_p2 }
  0x7c   : > { %v1817_v0 = vmov 0.0   ;;  %vm1818_vm0 = vmmov 0   ;;  %v388_v1 = vld [vmem:[#allocation7 + $0x18] sm:$0xff]  ;;  %v387_v2 = vld [vmem:[#allocation7 + $0x10] sm:$0xff]  ;;  %v386_v3 = vld [vmem:[#allocation7 + $0x8] sm:$0xff]  ;;  %vm396_vm1 = vcmask 261120  }
  0x7d   : > { %1790 = vsyncadd (%p2228_p6), [#allocation9], 4294966784  ;;  %1455 = vmatprep.subr.mxu0 %v1817_v0  ;;  %1463 = vmatprep.mubr.msk.f32.mxu0 %vm1818_vm0, %v1817_v0  ;;  %v385_v4 = vld [vmem:[#allocation7] sm:$0xff]  ;;  %v2067_v5 = vld [vmem:[%s331_s18] sm:$0xff]  ;;  %s1819_s4 = smov 64   ;;  %s1820_s14 = smov 96  }
  0x7e   : > { %1466 = vmatprep.subr.mxu1 %v1817_v0  ;;  %1468 = vmatprep.mubr.msk.f32.mxu1 %vm1818_vm0, %v1817_v0  ;;  %v1406_v6 = vld [vmem:[%s2196_s3] ss:$0 sm:$0xff]  ;;  %s1821_s23 = smov 88   ;;  %s1822_s25 = smov 120   ;;  %vm480_vm2 = vcmask 64512   ;;  %v1157_v62 = vld [vmem:[#allocation8 + $0x18] sm:$0xff] }
  0x7f   : > { %1456 = vmatpush3.msra.mxu0 %v388_v1  ;;  %s1823_s19 = smov 80   ;;  %s1824_s15 = smov 112   ;;  %v1408_v18 = vld [vmem:[%s339_s22] ss:$0 sm:$0xff]  ;;  %v1156_v1 = vld [vmem:[#allocation8 + $0x10] sm:$0xff]  ;;  %vm1150_vm3 = vcmask 130048  }
  0x80   : > { %1457 = vmatprep.subr.mxu0 %v1817_v0  ;;  %s1825_s2 = smov 72   ;;  %s1826_s21 = smov 104   ;;  %vm1152_vm4 = vcmask 195584  }
  0x81   : > { %1458 = vmatpush3.msra.mxu0 %v387_v2  ;;  %s1827_s29 = smov 56   ;;  %s1828_s24 = smov 40   ;;  %v1155_v2 = vld [vmem:[#allocation8 + $0x8] sm:$0xff] }
  0x82   : > { %1459 = vmatprep.subr.mxu0 %v1817_v0  ;;  %s1829_s18 = smov 48   ;;  %s1830_s13 = smov 8  }
  0x83   : > { %1460 = vmatpush3.msra.mxu0 %v386_v3  ;;  %v1154_v3 = vld [vmem:[#allocation8] sm:$0xff]  ;;  %s1831_s26 = smov 16   ;;  %s1832_s22 = smov 24  }
  0x84   : > { %1461 = vmatprep.subr.mxu0 %v1817_v0  ;;  %p2229_p7 = scmp.ne.s32.totalorder %s2218_s16, 0 }
  0x85   : > { %1462 = vmatpush3.msra.mxu0 %v385_v4 }
  0x86   : > { %1464 = vmatmul.mubr.msk.f32.vlgmr.msra.gmra.mxu0 %vm396_vm1, %v2067_v5  ;;  %1486 = vmatprep.subr.mxu0 %v1817_v0 }
  0x87   : > { %1488 = vmatprep.mubr.msk.f32.mxu0 %vm1818_vm0, %v1817_v0 }
 0x146   : > { %v466_v7 = vpop.f32.mrf.mxu0 }
 0x147   : > { %v2078_v8 = vadd.f32 %v1406_v6, %v466_v7 }
 0x148   : > { %v1465_v9 = vpop.f32.mrf.mxu0 }
 0x149   : > { %564 = vrot.lane.b32.xlu1 %v2078_v8, %s1819_s4  ;;  %478 = vrot.lane.b32.xlu0 %v2078_v8, %s1820_s14 }
 0x14d   : > { %644 = vrot.lane.b32.xlu1 %v2078_v8, %s1821_s23 }
 0x151   : > { %642 = vrot.lane.b32.xlu1 %v2078_v8, %s1822_s25 }
 0x155   : > { %809 = vrot.lane.b32.xlu1 %v2078_v8, %s1823_s19  ;;  %s1426_s19 = sshll.u32 %s1900_s9, 7 }
 0x159   : > { %807 = vrot.lane.b32.xlu1 %v2078_v8, %s1824_s15  ;;  %s383_s15 = scalar_lea.vmem [#allocation10], %s1402_s17 }
 0x15d   : > { %974 = vrot.lane.b32.xlu1 %v2078_v8, %s1825_s2  ;;  %s1284_s2 = sshll.u32 %s383_s15, 4  ;;  %s1285_s2 = int_to_ptr.vmem [resolvable:$true] %s1284_s2 }
 0x161   : > { %972 = vrot.lane.b32.xlu1 %v2078_v8, %s1826_s21 }
 0x1bb   : > { %v565_v10 = vpop.permute.xlu1 %564  ;;  %v479_v11 = vpop.permute.xlu0 %478 }
 0x1bc   : > { %1467 = vmatpush3.xpose.msk.msra.mxu1 %vm480_vm2, %v479_v11 }
 0x1bd   : > { %1471 = vmatprep.subr.mxu1 %v1817_v0 }
 0x1bf   : > { %v645_v12 = vpop.permute.xlu1 %644  ;;  %1469 = vmatmul.mubr.msk.f32.vlgmr.msra.gmra.mxu1 %vm480_vm2, %v2078_v8 }
 0x1c0   : > { %1472 = vmatpush3.msra.mxu1 %v565_v10  ;;  %1473 = vmatprep.mubr.msk.f32.mxu1 %vm1818_vm0, %v1817_v0 }
 0x1c1   : > { %1476 = vmatprep.subr.mxu1 %v1817_v0 }
 0x1c3   : > { %v643_v13 = vpop.permute.xlu1 %642 }
 0x1c7   : > { %v810_v14 = vpop.permute.xlu1 %809 }
 0x1c8   : > { %1487 = vmatpush3.xpose.msk.msra.mxu0 %vm480_vm2, %v810_v14 }
 0x1c9   : > { %1496 = vmatprep.subr.mxu0 %v1817_v0 }
 0x1cb   : > { %v808_v15 = vpop.permute.xlu1 %807 }
 0x1cc   : > { %1489 = vmatmul.mubr.msk.f32.vlgmr.msra.gmra.mxu0 %vm480_vm2, %v808_v15 }
 0x1cd   : > { %1498 = vmatprep.mubr.msk.f32.mxu0 %vm1818_vm0, %v1817_v0 }
 0x1cf   : > { %v975_v16 = vpop.permute.xlu1 %974 }
 0x1d0   : > { %1497 = vmatpush3.xpose.msk.msra.mxu0 %vm480_vm2, %v975_v16 }
 0x1d1   : > { %1506 = vmatprep.subr.mxu0 %v1817_v0 }
 0x1d3   : > { %v973_v17 = vpop.permute.xlu1 %972 }
 0x1d4   : > { %1499 = vmatmul.mubr.msk.f32.vlgmr.msra.gmra.mxu0 %vm480_vm2, %v973_v17 }
 0x1d5   : > { %1514 = vmatprep.mubr.msk.f32.mxu0 %vm1818_vm0, %v1817_v0  ;;  %1507 = vmatpush3.msra.mxu0 %v1157_v62 }
 0x1d6   : > { %1508 = vmatprep.subr.mxu0 %v1817_v0 }
 0x1d7   : > { %1509 = vmatpush3.msra.mxu0 %v1156_v1 }
 0x1d8   : > { %1510 = vmatprep.subr.mxu0 %v1817_v0 }
 0x1d9   : > { %1511 = vmatpush3.msra.mxu0 %v1155_v2 }
 0x1da   : > { %1512 = vmatprep.subr.mxu0 %v1817_v0 }
 0x1db   : > { %1513 = vmatpush3.msra.mxu0 %v1154_v3 }
 0x27f   : > { %v551_v19 = vpop.f32.mrf.mxu1 }
 0x280   : > { %v552_v20 = vadd.f32 %v1408_v18, %v551_v19 }
 0x281   : > { %v1470_v21 = vpop.f32.mrf.mxu1 }
 0x282   : > { %v555_v22 = vsel %vm480_vm2, %v552_v20, -inf }
 0x283   : > { %556 = vmax.xlane.f32.xlu0 %v555_v22 }
 0x28c   : > { %v881_v23 = vpop.f32.mrf.mxu0 }
 0x28d   : > { %v882_v27 = vadd.f32 %v1408_v18, %v881_v23 }
 0x28e   : > { %v1490_v24 = vpop.f32.mrf.mxu0 }
 0x28f   : > { %v885_v29 = vsel %vm480_vm2, %v882_v27, -inf }
 0x294   : > { %v1046_v25 = vpop.f32.mrf.mxu0 }
 0x295   : > { %v1047_v28 = vadd.f32 %v1408_v18, %v1046_v25  ;;  %v1421_v25 = vld [vmem:[%s2198_s5] ss:$0 sm:$0xff] }
 0x296   : > { %v1500_v26 = vpop.f32.mrf.mxu0 }
 0x297   : > { %v1050_v30 = vsel %vm480_vm2, %v1047_v28, -inf }
 0x299   : > { %729 = vrot.lane.b32.xlu0 %v2078_v8, %s1827_s29 }
 0x2b8   : > { %886 = vmax.xlane.f32.xlu0 %v885_v29 }
 0x2bc   : > { %1051 = vmax.xlane.f32.xlu0 %v1050_v30 }
 0x2d2   : > { %1059 = vrot.lane.b32.xlu0 %v2078_v8, %s1828_s24  ;;  %s1282_s24 = scalar_lea.hbm %s2201_s8, %s1426_s19 }
 0x30c   : > { %v557_v31 = vpop.xlane.xlu0 %556 }
 0x30d   : > { %v558_v32 = vsub.f32 %v552_v20, %v557_v31 }
 0x30f   : > { %v559_v33 = vmul.f32 1.442695, %v558_v32 }
 0x310   : > { %v730_v35 = vpop.permute.xlu0 %729 }
 0x311   : > { %1607 = vpow2.f32 %v559_v33 }
 0x31e   : > { %v1608_v34 = vpop.eup %1607 }
 0x31f   : > { %1474 = vmatmul.mubr.msk.f32.vlgmr.msra.gmra.mxu1 %vm480_vm2, %v1608_v34  ;;  %v561_v59 = vsel %vm480_vm2, %v1608_v34, 0.0 }
 0x320   : > { %1477 = vmatpush3.xpose.msk.msra.mxu1 %vm480_vm2, %v645_v12  ;;  %1478 = vmatprep.mubr.msk.f32.mxu1 %vm1818_vm0, %v1817_v0 }
 0x321   : > { %1481 = vmatprep.subr.mxu1 %v1817_v0 }
 0x323   : > { %1479 = vmatmul.mubr.msk.f32.vlgmr.msra.gmra.mxu1 %vm480_vm2, %v643_v13 }
 0x324   : > { %1482 = vmatpush3.msra.mxu1 %v730_v35  ;;  %1483 = vmatprep.mubr.msk.f32.mxu1 %vm1818_vm0, %v1817_v0 }
 0x325   : > { %1491 = vmatprep.subr.mxu1 %v1817_v0 }
 0x341   : > { %v887_v42 = vpop.xlane.xlu0 %886 }
 0x342   : > { %v888_v43 = vsub.f32 %v882_v27, %v887_v42 }
 0x344   : > { %v889_v44 = vmul.f32 1.442695, %v888_v43 }
 0x345   : > { %v1052_v47 = vpop.xlane.xlu0 %1051 }
 0x346   : > { %1609 = vpow2.f32 %v889_v44  ;;  %v1053_v48 = vsub.f32 %v1047_v28, %v1052_v47 }
 0x348   : > { %v1054_v51 = vmul.f32 1.442695, %v1053_v48 }
 0x349   : > { %v1060_v57 = vpop.permute.xlu0 %1059 }
 0x353   : > { %v1610_v45 = vpop.eup %1609 }
 0x354   : > { %v891_v46 = vsel %vm480_vm2, %v1610_v45, 0.0 }
 0x3df   : > { %v2121_v36 = vpop.f32.mrf.mxu1 }
 0x3e1   : > { %v1475_v37 = vpop.f32.mrf.mxu1 }
 0x3e3   : > { %v716_v38 = vpop.f32.mrf.mxu1 }
 0x3e4   : > { %v717_v39 = vadd.f32 %v1408_v18, %v716_v38 }
 0x3e5   : > { %v1480_v40 = vpop.f32.mrf.mxu1 }
 0x3e6   : > { %v720_v41 = vsel %vm480_vm2, %v717_v39, -inf }
 0x3e7   : > { %721 = vmax.xlane.f32.xlu1 %v720_v41  ;;  %v1424_v41 = vld [vmem:[%s2200_s7] ss:$0 sm:$0xff] }
 0x3f8   : > { %894 = vrot.lane.b32.xlu1 %v2078_v8, %s1829_s18  ;;  %s1271_s18 = scalar_lea.sflag [#allocation4], %s2035_s0 }
 0x41c   : > { %892 = vadd.xlane.f32.xlu1 %v891_v46 }
 0x470   : > { %v722_v49 = vpop.xlane.xlu1 %721 }
 0x471   : > { %v723_v50 = vsub.f32 %v717_v39, %v722_v49 }
 0x473   : > { %v724_v52 = vmul.f32 1.442695, %v723_v50 }
 0x474   : > { %v895_v54 = vpop.permute.xlu1 %894 }
 0x475   : > { %1611 = vpow2.f32 %v724_v52 }
 0x476   : > { %1613 = vpow2.f32 %v1054_v51 }
 0x482   : > { %v1612_v53 = vpop.eup %1611 }
 0x483   : > { %1484 = vmatmul.mubr.msk.f32.vlgmr.msra.gmra.mxu1 %vm480_vm2, %v1612_v53  ;;  %v726_v55 = vsel %vm480_vm2, %v1612_v53, 0.0  ;;  %v1614_v56 = vpop.eup %1613 }
 0x484   : > { %1492 = vmatpush3.msra.mxu1 %v895_v54  ;;  %727 = vadd.xlane.f32.xlu0 %v726_v55  ;;  %v1056_v58 = vsel %vm480_vm2, %v1614_v56, 0.0 }
 0x485   : > { %1493 = vmatprep.mubr.msk.f32.mxu1 %vm1818_vm0, %v1817_v0  ;;  %1501 = vmatprep.subr.mxu1 %v1817_v0 }
 0x487   : > { %1494 = vmatmul.mubr.msk.f32.vlgmr.msra.gmra.mxu1 %vm480_vm2, %v1610_v45 }
 0x488   : > { %1502 = vmatpush3.msra.mxu1 %v1060_v57  ;;  %1057 = vadd.xlane.f32.xlu0 %v1056_v58 }
 0x489   : > { %1503 = vmatprep.mubr.msk.f32.mxu1 %vm1818_vm0, %v1817_v0 }
 0x48b   : > { %1504 = vmatmul.mubr.msk.f32.vlgmr.msra.gmra.mxu1 %vm480_vm2, %v1614_v56 }
 0x48c   : > { %562 = vadd.xlane.f32.xlu0 %v561_v59 }
 0x4a5   : > { %v893_v61 = vpop.xlane.xlu1 %892 }
 0x50d   : > { %v728_v60 = vpop.xlane.xlu0 %727 }
 0x50e   : > { %1615 = vrcp.f32 %v728_v60 }
 0x50f   : > { %1617 = vrcp.f32 %v893_v61 }
 0x511   : > { %v1058_v63 = vpop.xlane.xlu0 %1057 }
 0x512   : > { %1619 = vrcp.f32 %v1058_v63 }
 0x515   : > { %v563_v0 = vpop.xlane.xlu0 %562 }
 0x516   : > { %1621 = vrcp.f32 %v563_v0 }
 0x51b   : > { %v1616_v4 = vpop.eup %1615 }
 0x51c   : > { %v1618_v9 = vpop.eup %1617 }
 0x51f   : > { %v1620_v13 = vpop.eup %1619 }
 0x523   : > { %v1622_v17 = vpop.eup %1621 }
 0x524   : > { %v641_v19 = vmul.f32 %v1622_v17, %v2121_v36 }
 0x543   : > { %v801_v6 = vpop.f32.mrf.mxu1 }
 0x544   : > { %v806_v7 = vmul.f32 %v1616_v4, %v801_v6 }
 0x545   : > { %v1485_v8 = vpop.f32.mrf.mxu1 }
 0x546   : > { %1138 = vrot.lane.b32.xlu0 %v806_v7, %s1830_s13  ;;  %s1733_s13 = scalar_lea.vmem %s1285_s2, 128 }
 0x547   : > { %v966_v10 = vpop.f32.mrf.mxu1  ;;  %p1734_p12 = scmp.ne.s32.totalorder %s1285_s2, %s1733_s13 }
 0x548   : > { %v971_v11 = vmul.f32 %v1618_v9, %v966_v10 }
 0x549   : > { %v1495_v12 = vpop.f32.mrf.mxu1  ;;  %p1735_p9 = pnand %p1734_p12, %p2229_p7 }
 0x54a   : > { %1142 = vrot.lane.b32.xlu1 %v971_v11, %s1831_s26  ;;  %s1833_s26 = smov [#allocation10]  }
 0x54b   : > { %v1131_v14 = vpop.f32.mrf.mxu1  ;;  %p1736_p13 = pneg %p1735_p9  ;;  %s1737_s9 = sshll.u32 %s1833_s26, 4  ;;  %s1738_s9 = int_to_ptr.vmem [resolvable:$false] %s1737_s9 }
 0x54c   : > { %v1136_v15 = vmul.f32 %v1620_v13, %v1131_v14  ;;  %s1739_s17 = scalar_lea.vmem %s1738_s9, 256  ;;  %p1740_p5 = scmp.lt.s32.totalorder %s1285_s2, %s1738_s9 }
 0x54d   : > { %v1505_v16 = vpop.f32.mrf.mxu1  ;;  %p1741_p1 = scmp.lt.s32.totalorder %s1739_s17, %s1733_s13 }
 0x54e   : > { %1146 = vrot.lane.b32.xlu0 %v1136_v15, %s1832_s22 }
 0x54f   : > { %p1742_p4 = por %p1741_p1, %p1740_p5 }
 0x551   : > { %p1743_p3 = pnand %p1742_p4, %p1736_p13 }
 0x5b8   : > { %v1139_v18 = vpop.permute.xlu0 %1138 }
 0x5b9   : > { %v1149_v21 = vsel %vm480_vm2, %v641_v19, %v1139_v18 }
 0x5bc   : > { %v1143_v20 = vpop.permute.xlu1 %1142 }
 0x5bd   : > { %v1151_v22 = vsel %vm1150_vm3, %v1149_v21, %v1143_v20 }
 0x5c0   : > { %v1147_v23 = vpop.permute.xlu0 %1146 }
 0x5c1   : > { %v1153_v24 = vsel %vm1152_vm4, %v1151_v22, %v1147_v23 }
 0x5c2   : > { %1515 = vmatmul.mubr.msk.f32.vlgmr.msra.gmra.mxu0 %vm396_vm1, %v1153_v24 }
 0x682   : > { %v1234_v26 = vpop.f32.mrf.mxu0 }
 0x683   : > { %v1235_v27 = vadd.f32 %v1421_v25, %v1234_v26 }
 0x684   : > { %v1516_v28 = vpop.f32.mrf.mxu0 }
 0x685   : > { %v1238_v29 = vadd.f32 %v1235_v27, %v2067_v5  ;;  %v1423_v5 = vld [vmem:[%s2199_s6] ss:$0 sm:$0xff] }
 0x687   : > { %v1239_v30 = vsel %vm396_vm1, %v1238_v29, 0.0 }
 0x688   : > { %1240 = vadd.xlane.f32.xlu0 %v1239_v30 }
 0x711   : > { %v1241_v31 = vpop.xlane.xlu0 %1240 }
 0x712   : > { %v1243_v32 = vmul.f32 0.03125, %v1241_v31 }
 0x714   : > { %v1244_v33 = vsub.f32 %v1238_v29, %v1243_v32 }
 0x716   : > { %v1245_v34 = vmul.f32 %v1244_v33, %v1244_v33 }
 0x718   : > { %v1246_v35 = vsel %vm396_vm1, %v1245_v34, 0.0 }
 0x719   : > { %1247 = vadd.xlane.f32.xlu1 %v1246_v35 }
 0x7a2   : > { %v1248_v36 = vpop.xlane.xlu1 %1247 }
 0x7a3   : > { %v1249_v37 = vmul.f32 0.03125, %v1248_v36 }
 0x7a5   : > { %v1250_v38 = vadd.f32 1e-12, %v1249_v37 }
 0x7a7   : > { %1623 = vrsqrt.f32 %v1250_v38 }
 0x7b4   : > { %v1624_v39 = vpop.eup %1623 }
 0x7b5   : > { %v1252_v40 = vmul.f32 %v1624_v39, %v1244_v33 }
 0x7b7   : > { %v1260_v42 = vmul.f32 %v1423_v5, %v1252_v40 }
 0x7b9   : > { %v1268_v43 = vadd.f32 %v1424_v41, %v1260_v42 }
 0x7bb   : > { %1269 = vst.msk [vmem:[%s383_s15] sm:$0xff] %vm396_vm1, %v1268_v43 }
 0x7bc   : > { %1746 = shalt.err (!%p1743_p3)
}
 0x7bd   : > { %s1747_s22 = scalar_lea.hbm %s1282_s24, 128  ;;  %s1751_s20 = scalar_lea.hbm %s2201_s8, 256 }
 0x7be   : > { %p1748_p10 = scmp.ne.s32.totalorder %s1282_s24, %s1747_s22  ;;  %p1752_p11 = scmp.lt.s32.totalorder %s1282_s24, %s2201_s8 }
 0x7bf   : > { %p1753_p2 = scmp.lt.s32.totalorder %s1751_s20, %s1747_s22 }
 0x7c0   : > { %p1749_p0 = pnand %p1748_p10, %p2229_p7 }
 0x7c1   : > { %p1754_p6 = por %p1753_p2, %p1752_p11 }
 0x7c2   : > { %p1750_p8 = pneg %p1749_p0 }
 0x7c4   : > { %p1755_p12 = pnand %p1754_p6, %p1750_p8 }
 0x7c6   : > { %1758 = shalt.err (!%p1755_p12)
}
 0x7c7   : > { %1529 = dma.vmem_to_hbm [thread:$0]  (%p2229_p7), %s1285_s2, 128, %s1282_s24, %s1271_s18  }
 0x7c8 PF: > { %s1296_s23 = sand.u32 1, %s1797_s27   ;;  %p2230_p9 = scmp.ne.s32.totalorder %s2212_s12, 0 }
 0x7c9   : > { %p2231_p13 = scmp.ge.s32.totalorder %s1809_s30, 2  ;;  %s1297_s25 = scalar_lea.sflag [#allocation4], %s1296_s23 }
 0x7cb   : > { %p1546_p5 = pnand %p2231_p13, %p2230_p9 }
 0x7cd   : > { %p1547_p1 = pneg %p1546_p5 }
 0x7cf   : > { %1792 = dma.done.wait (%p1547_p1), %s1297_s25, 128  }
 0x7d0   : > { %1794 = vsyncadd (%p1547_p1), %s1297_s25, 4294967168  ;;  %s2232_s19 = sld [smem:[#allocation16_spill]]  ;;  %p25_p4 = scmp.ge.s32.totalorder %s1951_s10, 4  }
 0x7d1   : > { %s2233_s29 = sld [smem:[#allocation17_spill]]  ;;  %s2234_s27 = smov %s1801_s28 }
 0x7d2   : > { %s2236_s30 = smov %s1951_s10  ;;  %27 = sbr.rel (!%p25_p4) target bundleno = 12 (0xc), region = 118 }
 0x7d6   : > { %s2235_s28 = smov %s2232_s19 }
 0x7d7   :  { %1302 = vsyncpa [#allocation3], 1 }
 0x7d8   :  { %1304 = vsyncpa [#allocation3 + $0x1], 1 }
 0x7d9   :  { %1305 = vsyncpa [#allocation6], 1 }
 0x7da   :  { %1307 = vsyncpa [#allocation6 + $0x1], 1 }
 0x7db   :  { %1308 = vsyncpa [#allocation9], 1 }
 0x7dc   :  { %1309 = vsyncpa [#allocation4], 1 }
 0x7dd   :  { %1311 = vsyncpa [#allocation4 + $0x1], 1 }

</bundles_post_ra>
